<compile_context>
chip_gen: v6e
topology: v6e:2x2x1
jax: 0.10.0
libtpu: 0.0.40
codegen_flags: <defaults>
</compile_context>

<pallas_src>
import jax
import jax.numpy as jnp
from jax.experimental import pallas as pl
from jax.experimental.pallas import tpu as pltpu

LEAKY_SLOPE = 0.2


def _lrelu(v):
    return jnp.where(v >= 0, v, LEAKY_SLOPE * v)


def pyramid_pooling_kernel(x_ref, g_ref, mw_ref, bmat_ref, brow_ref, o_ref, priors_ref):
    # x_ref     : (NB, C*H, W)        row-stacked input images, VMEM
    # g_ref     : (S*H, C*H)          fused channel-mix + H-pool matrix, VMEM
    # mw_ref    : (S, W, W)           per-stage W-pool/upsample matrices, VMEM
    # bmat_ref  : (C_out*H, K*H)      bottleneck weight ⊗ I_H, VMEM
    # brow_ref  : (C_out*H, 1)        bottleneck bias repeated per row, VMEM
    # o_ref     : (NB, C_out*H, W)    row-stacked output, VMEM
    # priors_ref: (K*H, W)            VMEM scratch: S stage planes then C feats
    NB = x_ref.shape[0]
    S = mw_ref.shape[0]
    H = g_ref.shape[0] // S
    SH = S * H
    KH = priors_ref.shape[0]
    CH = KH - SH  # C * H

    for b in range(NB):  # static unroll over the batch block
        xrow = x_ref[b].astype(jnp.float32)  # (C*H, W)

        # Channel mix + H-axis pool/upsample for all S stages: one MXU matmul.
        t = jnp.dot(g_ref[...], xrow, preferred_element_type=jnp.float32)  # (S*H, W)

        # W-axis pool/upsample per stage, LeakyReLU, stream into priors scratch.
        for s in range(S):
            ps = jnp.dot(
                t[s * H:(s + 1) * H, :], mw_ref[s],
                preferred_element_type=jnp.float32,
            )  # (H, W)
            priors_ref[pl.ds(s * H, H), :] = _lrelu(ps)

        # Raw feats occupy the trailing C*H rows (matches torch.cat order).
        priors_ref[pl.ds(SH, CH), :] = xrow

        # Bottleneck 1x1 conv (+bias) as one MXU matmul, then LeakyReLU.
        out = jnp.dot(
            bmat_ref[...], priors_ref[...], preferred_element_type=jnp.float32
        ) + brow_ref[...]
        o_ref[b] = _lrelu(out).astype(o_ref.dtype)


def _pool_upsample_matrix(n, scale):
    idx = jnp.arange(n) // scale
    return (idx[:, None] == idx[None, :]).astype(jnp.float32) / float(scale)


def _pick_batch_block(n, max_block=8):
    # Largest divisor of n <= max_block, preferring >=2 grid steps so the
    # parallel batch axis can shard across v7x's two TensorCores.
    divs = [d for d in range(1, min(n, max_block) + 1) if n % d == 0]
    pref = [d for d in divs if n // d >= 2]
    return max(pref) if pref else max(divs)


def pyramid_pooling(x, stage_w, bottleneck_w, bottleneck_b, scales, batch_block=None):
    """x: (N, C, H, W) float32. Returns (N, C_out, H, W)."""
    N, C, H, W = x.shape
    S = len(scales)
    C_out = bottleneck_w.shape[0]
    K = S + C
    assert bottleneck_w.shape[1] == K
    for s in scales:
        assert H % s == 0 and W % s == 0, "module requires H, W divisible by each scale"

    nb = _pick_batch_block(N) if batch_block is None else batch_block
    assert N % nb == 0

    f32 = jnp.float32
    eye_h = jnp.eye(H, dtype=f32)
    mh = [_pool_upsample_matrix(H, s) for s in scales]            # S x (H, H)
    mw = jnp.stack([_pool_upsample_matrix(W, s) for s in scales])  # (S, W, W)
    mh_bd = jax.scipy.linalg.block_diag(*mh)                       # (S*H, S*H)

    # Fused channel-mix + H-pool:  G[s*H+i, c*H+h] = stage_w[s,c] * M_h[s][i,h]
    g = mh_bd @ jnp.kron(stage_w.astype(f32), eye_h)               # (S*H, C*H)
    # Bottleneck weight lifted to the row-stacked layout: wb ⊗ I_H
    bmat = jnp.kron(bottleneck_w.astype(f32), eye_h)               # (C_out*H, K*H)
    brow = jnp.repeat(bottleneck_b.astype(f32), H)[:, None]        # (C_out*H, 1)

    x_rows = x.reshape(N, C * H, W)  # free reshape of contiguous NCHW

    grid_spec = pltpu.PrefetchScalarGridSpec(
        num_scalar_prefetch=0,
        grid=(N // nb,),
        in_specs=[
            pl.BlockSpec((nb, C * H, W), lambda i: (i, 0, 0)),
            pl.BlockSpec((S * H, C * H), lambda i: (0, 0)),
            pl.BlockSpec((S, W, W), lambda i: (0, 0, 0)),
            pl.BlockSpec((C_out * H, K * H), lambda i: (0, 0)),
            pl.BlockSpec((C_out * H, 1), lambda i: (0, 0)),
        ],
        out_specs=pl.BlockSpec((nb, C_out * H, W), lambda i: (i, 0, 0)),
        scratch_shapes=[pltpu.VMEM((K * H, W), jnp.float32)],
    )

    out_rows = pl.pallas_call(
        pyramid_pooling_kernel,
        out_shape=jax.ShapeDtypeStruct((N, C_out * H, W), x.dtype),
        grid_spec=grid_spec,
        compiler_params=pltpu.CompilerParams(
            dimension_semantics=("parallel",),
            vmem_limit_bytes=32 * 1024 * 1024,
        ),
    )(x_rows, g, mw, bmat, brow)

    return out_rows.reshape(N, C_out, H, W)


def pyramid_pooling_reference(x, stage_w, bottleneck_w, bottleneck_b, scales):
    """Pure-JAX reference matching the PyTorch forward exactly."""
    N, C, H, W = x.shape
    priors = []
    for si, s in enumerate(scales):
        pooled = x.reshape(N, C, H // s, s, W // s, s).mean(axis=(3, 5))
        conv = jnp.einsum("c,nchw->nhw", stage_w[si], pooled)  # 1x1 conv, no bias
        act = _lrelu(conv)
        up = jnp.repeat(jnp.repeat(act, s, axis=1), s, axis=2)  # nearest upsample
        priors.append(up[:, None])
    priors.append(x)
    cat = jnp.concatenate(priors, axis=1)  # (N, S+C, H, W)
    out = jnp.einsum("ok,nkhw->nohw", bottleneck_w, cat) + bottleneck_b[None, :, None, None]
    return _lrelu(out)


if __name__ == "__main__":
    key = jax.random.PRNGKey(0)
    scales = (4, 8, 16, 32)

    N, C_in, C_out = 2, 4, 8
    H = W = 32  # divisible by every scale (required by the module's semantics)
    S = len(scales)

    k1, k2, k3, k4 = jax.random.split(key, 4)
    x = jax.random.normal(k1, (N, C_in, H, W), dtype=jnp.float32)
    # Stage convs: Conv2d(C_in, ct_channels=1, 1x1, bias=False) -> weight (C_in,) each.
    stage_w = 0.5 * jax.random.normal(k2, (S, C_in), dtype=jnp.float32)
    # Bottleneck: Conv2d(C_in + S, C_out, 1x1) with bias.
    bottleneck_w = 0.5 * jax.random.normal(k3, (C_out, S + C_in), dtype=jnp.float32)
    bottleneck_b = 0.1 * jax.random.normal(k4, (C_out,), dtype=jnp.float32)

    out = pyramid_pooling(x, stage_w, bottleneck_w, bottleneck_b, scales)
    out = jax.block_until_ready(out)

    ref = pyramid_pooling_reference(x, stage_w, bottleneck_w, bottleneck_b, scales)
    if not jnp.allclose(out, ref, atol=2e-2, rtol=2e-2):
        raise AssertionError("Pallas PyramidPooling does not match reference")

    print("KERNEL_OK")
</pallas_src>

<mosaic_0001>
module attributes {stable_mosaic.version = 11 : i64} {
  func.func @pyramid_pooling_kernel(%arg0: i32, %arg1: memref<1x128x32xf32, #tpu.memory_space<vmem>>, %arg2: memref<128x128xf32, #tpu.memory_space<vmem>>, %arg3: memref<4x32x32xf32, #tpu.memory_space<vmem>>, %arg4: memref<256x256xf32, #tpu.memory_space<vmem>>, %arg5: memref<256x1xf32, #tpu.memory_space<vmem>>, %arg6: memref<1x256x32xf32, #tpu.memory_space<vmem>>, %arg7: memref<256x32xf32, #tpu.memory_space<vmem>>) attributes {dimension_semantics = [#tpu.dimension_semantics<parallel>], iteration_bounds = array<i64: 2>, scalar_prefetch = 0 : i64, scratch_operands = 1 : i64, tpu.core_type = #tpu.core_type<tc>, window_params = [{transform_indices = @transform_0, window_bounds = array<i64: 1, 128, 32>}, {pipeline_mode = #tpu.pipeline_mode<synchronous>, transform_indices = @transform_1, window_bounds = array<i64: 128, 128>}, {pipeline_mode = #tpu.pipeline_mode<synchronous>, transform_indices = @transform_2, window_bounds = array<i64: 4, 32, 32>}, {pipeline_mode = #tpu.pipeline_mode<synchronous>, transform_indices = @transform_3, window_bounds = array<i64: 256, 256>}, {pipeline_mode = #tpu.pipeline_mode<synchronous>, transform_indices = @transform_4, window_bounds = array<i64: 256, 1>}, {transform_indices = @transform_5, window_bounds = array<i64: 1, 256, 32>}]} {
    %c0 = arith.constant 0 : index
    %c0_0 = arith.constant 0 : index
    %c0_1 = arith.constant 0 : index
    %0 = vector.load %arg1[%c0, %c0_0, %c0_1] : memref<1x128x32xf32, #tpu.memory_space<vmem>>, vector<1x128x32xf32>
    %1 = vector.shape_cast %0 : vector<1x128x32xf32> to vector<128x32xf32>
    %c0_2 = arith.constant 0 : index
    %c0_3 = arith.constant 0 : index
    %2 = vector.load %arg2[%c0_2, %c0_3] : memref<128x128xf32, #tpu.memory_space<vmem>>, vector<128x128xf32>
    %cst = arith.constant dense<0.000000e+00> : vector<128x32xf32>
    %3 = tpu.matmul %2, %1, %cst {dimension_numbers = #tpu.dot_dimension_numbers<[1], [0], [0], [1], [0, 0, 1, 1], [], []>} : vector<128x128xf32>, vector<128x32xf32>, vector<128x32xf32> -> vector<128x32xf32>
    %4 = vector.extract_strided_slice %3 {offsets = [0, 0], sizes = [32, 32], strides = [1, 1]} : vector<128x32xf32> to vector<32x32xf32>
    %c0_4 = arith.constant 0 : index
    %c0_5 = arith.constant 0 : index
    %c0_6 = arith.constant 0 : index
    %5 = vector.load %arg3[%c0_4, %c0_5, %c0_6] : memref<4x32x32xf32, #tpu.memory_space<vmem>>, vector<1x32x32xf32>
    %6 = vector.shape_cast %5 : vector<1x32x32xf32> to vector<32x32xf32>
    %cst_7 = arith.constant dense<0.000000e+00> : vector<32x32xf32>
    %7 = tpu.matmul %4, %6, %cst_7 {dimension_numbers = #tpu.dot_dimension_numbers<[1], [0], [0], [1], [0, 0, 1, 1], [], []>} : vector<32x32xf32>, vector<32x32xf32>, vector<32x32xf32> -> vector<32x32xf32>
    %cst_8 = arith.constant 0.000000e+00 : f32
    %8 = vector.broadcast %cst_8 : f32 to vector<32x32xf32>
    %9 = arith.cmpf oge, %7, %8 : vector<32x32xf32>
    %cst_9 = arith.constant 2.000000e-01 : f32
    %10 = vector.broadcast %cst_9 : f32 to vector<32x32xf32>
    %11 = arith.mulf %10, %7 : vector<32x32xf32>
    %12 = arith.select %9, %7, %11 : vector<32x32xi1>, vector<32x32xf32>
    %c0_10 = arith.constant 0 : index
    %c0_11 = arith.constant 0 : index
    %13 = vector.load %arg7[%c0_10, %c0_11] : memref<256x32xf32, #tpu.memory_space<vmem>>, vector<32x32xf32>
    tpu.vector_store %arg7[%c0_10, %c0_11], %12 {strides = array<i32>} : memref<256x32xf32, #tpu.memory_space<vmem>>, vector<32x32xf32>,
    %14 = vector.extract_strided_slice %3 {offsets = [32, 0], sizes = [32, 32], strides = [1, 1]} : vector<128x32xf32> to vector<32x32xf32>
    %c1 = arith.constant 1 : index
    %c0_12 = arith.constant 0 : index
    %c0_13 = arith.constant 0 : index
    %15 = vector.load %arg3[%c1, %c0_12, %c0_13] : memref<4x32x32xf32, #tpu.memory_space<vmem>>, vector<1x32x32xf32>
    %16 = vector.shape_cast %15 : vector<1x32x32xf32> to vector<32x32xf32>
    %cst_14 = arith.constant dense<0.000000e+00> : vector<32x32xf32>
    %17 = tpu.matmul %14, %16, %cst_14 {dimension_numbers = #tpu.dot_dimension_numbers<[1], [0], [0], [1], [0, 0, 1, 1], [], []>} : vector<32x32xf32>, vector<32x32xf32>, vector<32x32xf32> -> vector<32x32xf32>
    %cst_15 = arith.constant 0.000000e+00 : f32
    %18 = vector.broadcast %cst_15 : f32 to vector<32x32xf32>
    %19 = arith.cmpf oge, %17, %18 : vector<32x32xf32>
    %cst_16 = arith.constant 2.000000e-01 : f32
    %20 = vector.broadcast %cst_16 : f32 to vector<32x32xf32>
    %21 = arith.mulf %20, %17 : vector<32x32xf32>
    %22 = arith.select %19, %17, %21 : vector<32x32xi1>, vector<32x32xf32>
    %c32 = arith.constant 32 : index
    %c0_17 = arith.constant 0 : index
    %23 = vector.load %arg7[%c32, %c0_17] : memref<256x32xf32, #tpu.memory_space<vmem>>, vector<32x32xf32>
    tpu.vector_store %arg7[%c32, %c0_17], %22 {strides = array<i32>} : memref<256x32xf32, #tpu.memory_space<vmem>>, vector<32x32xf32>,
    %24 = vector.extract_strided_slice %3 {offsets = [64, 0], sizes = [32, 32], strides = [1, 1]} : vector<128x32xf32> to vector<32x32xf32>
    %c2 = arith.constant 2 : index
    %c0_18 = arith.constant 0 : index
    %c0_19 = arith.constant 0 : index
    %25 = vector.load %arg3[%c2, %c0_18, %c0_19] : memref<4x32x32xf32, #tpu.memory_space<vmem>>, vector<1x32x32xf32>
    %26 = vector.shape_cast %25 : vector<1x32x32xf32> to vector<32x32xf32>
    %cst_20 = arith.constant dense<0.000000e+00> : vector<32x32xf32>
    %27 = tpu.matmul %24, %26, %cst_20 {dimension_numbers = #tpu.dot_dimension_numbers<[1], [0], [0], [1], [0, 0, 1, 1], [], []>} : vector<32x32xf32>, vector<32x32xf32>, vector<32x32xf32> -> vector<32x32xf32>
    %cst_21 = arith.constant 0.000000e+00 : f32
    %28 = vector.broadcast %cst_21 : f32 to vector<32x32xf32>
    %29 = arith.cmpf oge, %27, %28 : vector<32x32xf32>
    %cst_22 = arith.constant 2.000000e-01 : f32
    %30 = vector.broadcast %cst_22 : f32 to vector<32x32xf32>
    %31 = arith.mulf %30, %27 : vector<32x32xf32>
    %32 = arith.select %29, %27, %31 : vector<32x32xi1>, vector<32x32xf32>
    %c64 = arith.constant 64 : index
    %c0_23 = arith.constant 0 : index
    %33 = vector.load %arg7[%c64, %c0_23] : memref<256x32xf32, #tpu.memory_space<vmem>>, vector<32x32xf32>
    tpu.vector_store %arg7[%c64, %c0_23], %32 {strides = array<i32>} : memref<256x32xf32, #tpu.memory_space<vmem>>, vector<32x32xf32>,
    %34 = vector.extract_strided_slice %3 {offsets = [96, 0], sizes = [32, 32], strides = [1, 1]} : vector<128x32xf32> to vector<32x32xf32>
    %c3 = arith.constant 3 : index
    %c0_24 = arith.constant 0 : index
    %c0_25 = arith.constant 0 : index
    %35 = vector.load %arg3[%c3, %c0_24, %c0_25] : memref<4x32x32xf32, #tpu.memory_space<vmem>>, vector<1x32x32xf32>
    %36 = vector.shape_cast %35 : vector<1x32x32xf32> to vector<32x32xf32>
    %cst_26 = arith.constant dense<0.000000e+00> : vector<32x32xf32>
    %37 = tpu.matmul %34, %36, %cst_26 {dimension_numbers = #tpu.dot_dimension_numbers<[1], [0], [0], [1], [0, 0, 1, 1], [], []>} : vector<32x32xf32>, vector<32x32xf32>, vector<32x32xf32> -> vector<32x32xf32>
    %cst_27 = arith.constant 0.000000e+00 : f32
    %38 = vector.broadcast %cst_27 : f32 to vector<32x32xf32>
    %39 = arith.cmpf oge, %37, %38 : vector<32x32xf32>
    %cst_28 = arith.constant 2.000000e-01 : f32
    %40 = vector.broadcast %cst_28 : f32 to vector<32x32xf32>
    %41 = arith.mulf %40, %37 : vector<32x32xf32>
    %42 = arith.select %39, %37, %41 : vector<32x32xi1>, vector<32x32xf32>
    %c96 = arith.constant 96 : index
    %c0_29 = arith.constant 0 : index
    %43 = vector.load %arg7[%c96, %c0_29] : memref<256x32xf32, #tpu.memory_space<vmem>>, vector<32x32xf32>
    tpu.vector_store %arg7[%c96, %c0_29], %42 {strides = array<i32>} : memref<256x32xf32, #tpu.memory_space<vmem>>, vector<32x32xf32>,
    %c128 = arith.constant 128 : index
    %c0_30 = arith.constant 0 : index
    %44 = vector.load %arg7[%c128, %c0_30] : memref<256x32xf32, #tpu.memory_space<vmem>>, vector<128x32xf32>
    tpu.vector_store %arg7[%c128, %c0_30], %1 {strides = array<i32>} : memref<256x32xf32, #tpu.memory_space<vmem>>, vector<128x32xf32>,
    %c0_31 = arith.constant 0 : index
    %c0_32 = arith.constant 0 : index
    %45 = vector.load %arg4[%c0_31, %c0_32] : memref<256x256xf32, #tpu.memory_space<vmem>>, vector<256x256xf32>
    %c0_33 = arith.constant 0 : index
    %c0_34 = arith.constant 0 : index
    %46 = vector.load %arg7[%c0_33, %c0_34] : memref<256x32xf32, #tpu.memory_space<vmem>>, vector<256x32xf32>
    %cst_35 = arith.constant dense<0.000000e+00> : vector<256x32xf32>
    %47 = tpu.matmul %45, %46, %cst_35 {dimension_numbers = #tpu.dot_dimension_numbers<[1], [0], [0], [1], [0, 0, 1, 1], [], []>} : vector<256x256xf32>, vector<256x32xf32>, vector<256x32xf32> -> vector<256x32xf32>
    %c0_36 = arith.constant 0 : index
    %c0_37 = arith.constant 0 : index
    %48 = vector.load %arg5[%c0_36, %c0_37] : memref<256x1xf32, #tpu.memory_space<vmem>>, vector<256x1xf32>
    %49 = vector.broadcast %48 : vector<256x1xf32> to vector<256x32xf32>
    %50 = arith.addf %47, %49 : vector<256x32xf32>
    %cst_38 = arith.constant 0.000000e+00 : f32
    %51 = vector.broadcast %cst_38 : f32 to vector<256x32xf32>
    %52 = arith.cmpf oge, %50, %51 : vector<256x32xf32>
    %cst_39 = arith.constant 2.000000e-01 : f32
    %53 = vector.broadcast %cst_39 : f32 to vector<256x32xf32>
    %54 = arith.mulf %53, %50 : vector<256x32xf32>
    %55 = arith.select %52, %50, %54 : vector<256x32xi1>, vector<256x32xf32>
    %c0_40 = arith.constant 0 : index
    %c0_41 = arith.constant 0 : index
    %c0_42 = arith.constant 0 : index
    %56 = vector.load %arg6[%c0_40, %c0_41, %c0_42] : memref<1x256x32xf32, #tpu.memory_space<vmem>>, vector<1x256x32xf32>
    %57 = vector.shape_cast %56 : vector<1x256x32xf32> to vector<256x32xf32>
    %58 = vector.shape_cast %55 : vector<256x32xf32> to vector<1x256x32xf32>
    tpu.vector_store %arg6[%c0_40, %c0_41, %c0_42], %58 {strides = array<i32>} : memref<1x256x32xf32, #tpu.memory_space<vmem>>, vector<1x256x32xf32>,
    return
  }
  func.func @transform_0(%arg0: i32) -> (i32, i32, i32) {
    %c0_i32 = arith.constant 0 : i32
    %c0_i32_0 = arith.constant 0 : i32
    %c0_i32_1 = arith.constant 0 : i32
    return %arg0, %c0_i32, %c0_i32_0 : i32, i32, i32
  }
  func.func @transform_1(%arg0: i32) -> (i32, i32) {
    %c0_i32 = arith.constant 0 : i32
    %c0_i32_0 = arith.constant 0 : i32
    %c0_i32_1 = arith.constant 0 : i32
    return %c0_i32, %c0_i32_0 : i32, i32
  }
  func.func @transform_2(%arg0: i32) -> (i32, i32, i32) {
    %c0_i32 = arith.constant 0 : i32
    %c0_i32_0 = arith.constant 0 : i32
    %c0_i32_1 = arith.constant 0 : i32
    %c0_i32_2 = arith.constant 0 : i32
    return %c0_i32, %c0_i32_0, %c0_i32_1 : i32, i32, i32
  }
  func.func @transform_3(%arg0: i32) -> (i32, i32) {
    %c0_i32 = arith.constant 0 : i32
    %c0_i32_0 = arith.constant 0 : i32
    %c0_i32_1 = arith.constant 0 : i32
    return %c0_i32, %c0_i32_0 : i32, i32
  }
  func.func @transform_4(%arg0: i32) -> (i32, i32) {
    %c0_i32 = arith.constant 0 : i32
    %c0_i32_0 = arith.constant 0 : i32
    %c0_i32_1 = arith.constant 0 : i32
    return %c0_i32, %c0_i32_0 : i32, i32
  }
  func.func @transform_5(%arg0: i32) -> (i32, i32, i32) {
    %c0_i32 = arith.constant 0 : i32
    %c0_i32_0 = arith.constant 0 : i32
    %c0_i32_1 = arith.constant 0 : i32
    return %arg0, %c0_i32, %c0_i32_0 : i32, i32, i32
  }
}

</mosaic_0001>

<bundles_post_ra>
// kernel: tpu_custom_call.1
= control target key start
LH: loop header
LB: loop body
LE: loop exit
PB: predicated region body
PF: predicated region fallthrough
CT: control target
= control target key end

     0   :  { %10 = vsyncpa [#allocation4], 0  ;;  %s2636_s0 = inlined_call_operand.vmem [shape: f32[2,128,32], index: 0, kind: input, shape index: {}]   ;;  %s2637_s1 = inlined_call_operand.hbm [shape: f32[128,128], index: 1, kind: input, shape index: {}]   ;;  %s2638_s2 = inlined_call_operand.hbm [shape: f32[4,32,32], index: 2, kind: input, shape index: {}]   ;;  %s2639_s3 = inlined_call_operand.vmem [shape: f32[256,256], index: 3, kind: input, shape index: {}]   ;;  %s2640_s4 = inlined_call_operand.vmem [shape: f32[256,1], index: 4, kind: input, shape index: {}]   ;;  %s2641_s5 = inlined_call_operand.vmem [shape: f32[2,256,32], index: 5, kind: output, shape index: {}]  }
   0x1   :  { %11 = vsyncpa [#allocation6], 0  ;;  %s2050_s18 = smov 0  }
   0x2 LB: > { %s2056_s19 = sadd.s32 4294967295, %s2012_s18   ;;  %p1640_p0 = scmp.ge.s32.totalorder %s2012_s18, 1  ;;  %s2012_s18 = sphi %s2050_s18, %s17_s18  }
   0x3   : > { %p158_p1 = scmp.lt.s32.totalorder %s2012_s18, 3  ;;  %s2014_s20 = smov [#allocation3]  }
   0x4   : > { %s170_s21 = sshll.u32 %s2014_s20, 4  ;;  %p1926_p3 = scmp.eq.s32.totalorder %s2056_s19, 0  ;;  %s171_s21 = int_to_ptr.vmem [resolvable:$true] %s170_s21 }
   0x5   : > { %p2060_p2 = pnand %p1640_p0, %p158_p1  ;;  %s2015_s23 = smov [#allocation5]  }
   0x6   : > { %s183_s24 = sshll.u32 %s2015_s23, 4  ;;  %s1957_s26 = scalar_lea.vmem %s171_s21, 2048  ;;  %s184_s24 = int_to_ptr.vmem [resolvable:$true] %s183_s24 }
   0x7   : > { %p1919_p4 = pneg %p2060_p2  ;;  %p1958_p7 = scmp.ne.s32.totalorder %s171_s21, %s1957_s26 }
   0x8   : > { %p1965_p10 = scmp.lt.s32.totalorder %s171_s21, %s171_s21  ;;  %p1966_p11 = scmp.lt.s32.totalorder %s1957_s26, %s1957_s26 }
   0x9   : > { %p2069_p5 = pnand %p1926_p3, %p1919_p4 }
   0xa   : > { %p1967_p12 = por %p1966_p11, %p1965_p10 }
   0xb   : > { %p1948_p6 = pneg %p2069_p5 }
   0xd   : > { %p1960_p8 = pnand %p1958_p7, %p1948_p6 }
   0xf   : > { %p1961_p9 = pneg %p1960_p8 }
  0x11   : > { %p1968_p13 = pnand %p1967_p12, %p1961_p9 }
  0x13   : > { %1971 = shalt.err (!%p1968_p13)
}
  0x14   : > { %s2016_s27 = smov 128   ;;  %s2017_s28 = smov 8  }
  0x15   : > { %1922 = dma.hbm_to_vmem [thread:$0]  (!%p2069_p5), %s2637_s1, 2048, %s171_s21, [#allocation4], %s2016_s27, %s2016_s27, %s2017_s28  }
  0x16   : > { %s1983_s6 = scalar_lea.vmem %s184_s24, 2048  ;;  %p1991_p7 = scmp.lt.s32.totalorder %s184_s24, %s184_s24 }
  0x17   : > { %p1984_p0 = scmp.ne.s32.totalorder %s184_s24, %s1983_s6  ;;  %p1992_p8 = scmp.lt.s32.totalorder %s1983_s6, %s1983_s6 }
  0x19   : > { %p1986_p1 = pnand %p1984_p0, %p1948_p6  ;;  %p1993_p10 = por %p1992_p8, %p1991_p7 }
  0x1b   : > { %p1987_p4 = pneg %p1986_p1 }
  0x1d   : > { %p1994_p9 = pnand %p1993_p10, %p1987_p4 }
  0x1f   : > { %1997 = shalt.err (!%p1994_p9)
}
  0x20   : > { %1925 = dma.hbm_to_vmem [thread:$0]  (!%p2069_p5), %s2638_s2, 2048, %s184_s24, [#allocation6], %s2016_s27, %s2016_s27, %s2017_s28  }
  0x21   : > { %213 = sbr.rel (%p2060_p2) target bundleno = 829 (0x33d), region = 40 }
  0x26   : > { %2003 = dma.done.wait (%p1926_p3), [#allocation4], 2048  }
  0x27   : > { %2005 = vsyncadd (%p1926_p3), [#allocation4], 4294965248 }
  0x28   : > { %2007 = dma.done.wait (%p1926_p3), [#allocation6], 2048  }
  0x29   : > { %2009 = vsyncadd (%p1926_p3), [#allocation6], 4294965248  ;;  %p245_p6 = scmp.lt.s32.totalorder %s2056_s19, 1  ;;  %vm436_vm0 = vcmask 261120   ;;  %v271_v16 = vld [vmem:[#allocation3] sm:$0xff]  ;;  %v435_v17 = vld [vmem:[#allocation5 + $0x18] sm:$0xff] }
  0x2a   : > { %1767 = vmatprep.mubr.f32.mxu0 %v271_v16  ;;  %1791 = vmatprep.subr.mxu1 %v435_v17  ;;  %v434_v18 = vld [vmem:[#allocation5 + $0x10] sm:$0xff]  ;;  %v433_v19 = vld [vmem:[#allocation5 + $0x8] sm:$0xff]  ;;  %v274_v22 = vld [vmem:[#allocation3 + $0x18] sm:$0xff] }
  0x2b   : > { %s2645_s19 = smov (!%p245_p6, %s2056_s19), 1  ;;  %1792 = vmatpush3.msra.mxu1 %v435_v17  ;;  %v272_v20 = vld [vmem:[#allocation3 + $0x8] sm:$0xff]  ;;  %v273_v21 = vld [vmem:[#allocation3 + $0x10] sm:$0xff]  ;;  %v275_v23 = vld [vmem:[#allocation3 + $0x20] sm:$0xff] }
  0x2c   : > { %s1669_s9 = sshll.u32 %s2645_s19, 7  ;;  %1793 = vmatprep.subr.mxu1 %v434_v18  ;;  %v276_v24 = vld [vmem:[#allocation3 + $0x28] sm:$0xff]  ;;  %v277_v25 = vld [vmem:[#allocation3 + $0x30] sm:$0xff]  ;;  %v278_v26 = vld [vmem:[#allocation3 + $0x38] sm:$0xff]  ;;  %s1670_s23 = sshll.u32 %s2645_s19, 8 }
  0x2d   : > { %s2109_s12 = scalar_lea.vmem %s2636_s0, %s1669_s9  ;;  %1794 = vmatpush3.msra.mxu1 %v434_v18  ;;  %v279_v27 = vld [vmem:[#allocation3 + $0x40] sm:$0xff]  ;;  %v280_v28 = vld [vmem:[#allocation3 + $0x48] sm:$0xff]  ;;  %v281_v29 = vld [vmem:[#allocation3 + $0x50] sm:$0xff]  ;;  %s2555_s26 = scalar_lea.vmem %s2641_s5, %s1670_s23 }
  0x2e   : > { %v270_v0 = vld [vmem:[%s2109_s12 + $0x78] sm:$0xff]  ;;  %v269_v1 = vld [vmem:[%s2109_s12 + $0x70] sm:$0xff]  ;;  %v268_v2 = vld [vmem:[%s2109_s12 + $0x68] sm:$0xff]  ;;  %1795 = vmatprep.subr.mxu1 %v433_v19 }
  0x2f   : > { %1735 = vmatprep.subr.mxu0 %v270_v0  ;;  %919 = vst.msk [vmem:[#allocation2 + $0xf8] sm:$0xff] %vm436_vm0, %v270_v0  ;;  %918 = vst.msk [vmem:[#allocation2 + $0xf0] sm:$0xff] %vm436_vm0, %v269_v1  ;;  %v267_v3 = vld [vmem:[%s2109_s12 + $0x60] sm:$0xff]  ;;  %v266_v4 = vld [vmem:[%s2109_s12 + $0x58] sm:$0xff]  ;;  %1796 = vmatpush3.msra.mxu1 %v433_v19 }
  0x30   : > { %917 = vst.msk [vmem:[#allocation2 + $0xe8] sm:$0xff] %vm436_vm0, %v268_v2  ;;  %v265_v5 = vld [vmem:[%s2109_s12 + $0x50] sm:$0xff]  ;;  %1736 = vmatpush3.msra.mxu0 %v270_v0  ;;  %916 = vst.msk [vmem:[#allocation2 + $0xe0] sm:$0xff] %vm436_vm0, %v267_v3  ;;  %v264_v6 = vld [vmem:[%s2109_s12 + $0x48] sm:$0xff]  ;;  %v2018_v0 = vmov 0.0  }
  0x31   : > { %915 = vst.msk [vmem:[#allocation2 + $0xd8] sm:$0xff] %vm436_vm0, %v266_v4  ;;  %914 = vst.msk [vmem:[#allocation2 + $0xd0] sm:$0xff] %vm436_vm0, %v265_v5  ;;  %v263_v7 = vld [vmem:[%s2109_s12 + $0x40] sm:$0xff]  ;;  %v262_v8 = vld [vmem:[%s2109_s12 + $0x38] sm:$0xff]  ;;  %1737 = vmatprep.subr.mxu0 %v269_v1 }
  0x32   : > { %913 = vst.msk [vmem:[#allocation2 + $0xc8] sm:$0xff] %vm436_vm0, %v264_v6  ;;  %912 = vst.msk [vmem:[#allocation2 + $0xc0] sm:$0xff] %vm436_vm0, %v263_v7  ;;  %v261_v9 = vld [vmem:[%s2109_s12 + $0x30] sm:$0xff]  ;;  %v260_v10 = vld [vmem:[%s2109_s12 + $0x28] sm:$0xff]  ;;  %1738 = vmatpush3.msra.mxu0 %v269_v1 }
  0x33   : > { %911 = vst.msk [vmem:[#allocation2 + $0xb8] sm:$0xff] %vm436_vm0, %v262_v8  ;;  %v259_v11 = vld [vmem:[%s2109_s12 + $0x20] sm:$0xff]  ;;  %910 = vst.msk [vmem:[#allocation2 + $0xb0] sm:$0xff] %vm436_vm0, %v261_v9  ;;  %v258_v12 = vld [vmem:[%s2109_s12 + $0x18] sm:$0xff]  ;;  %1739 = vmatprep.subr.mxu0 %v268_v2 }
  0x34   : > { %909 = vst.msk [vmem:[#allocation2 + $0xa8] sm:$0xff] %vm436_vm0, %v260_v10  ;;  %908 = vst.msk [vmem:[#allocation2 + $0xa0] sm:$0xff] %vm436_vm0, %v259_v11  ;;  %v257_v13 = vld [vmem:[%s2109_s12 + $0x10] sm:$0xff]  ;;  %v256_v14 = vld [vmem:[%s2109_s12 + $0x8] sm:$0xff]  ;;  %1740 = vmatpush3.msra.mxu0 %v268_v2 }
  0x35   : > { %907 = vst.msk [vmem:[#allocation2 + $0x98] sm:$0xff] %vm436_vm0, %v258_v12  ;;  %906 = vst.msk [vmem:[#allocation2 + $0x90] sm:$0xff] %vm436_vm0, %v257_v13  ;;  %v255_v15 = vld [vmem:[%s2109_s12] sm:$0xff]  ;;  %1741 = vmatprep.subr.mxu0 %v267_v3  ;;  %v282_v30 = vld [vmem:[#allocation3 + $0x58] sm:$0xff] }
  0x36   : > { %905 = vst.msk [vmem:[#allocation2 + $0x88] sm:$0xff] %vm436_vm0, %v256_v14  ;;  %904 = vst.msk [vmem:[#allocation2 + $0x80] sm:$0xff] %vm436_vm0, %v255_v15  ;;  %1742 = vmatpush3.msra.mxu0 %v267_v3  ;;  %v283_v31 = vld [vmem:[#allocation3 + $0x60] sm:$0xff]  ;;  %v284_v32 = vld [vmem:[#allocation3 + $0x68] sm:$0xff]  ;;  %v2019_v3 = vmov 0  }
  0x37   : > { %1743 = vmatprep.subr.mxu0 %v266_v4  ;;  %v285_v33 = vld [vmem:[#allocation3 + $0x70] sm:$0xff]  ;;  %v286_v34 = vld [vmem:[#allocation3 + $0x78] sm:$0xff]  ;;  %v432_v35 = vld [vmem:[#allocation5] sm:$0xff]  ;;  %1945 = vset.pattern.permute.xlu1 %v2019_v3 }
  0x38   : > { %1744 = vmatpush3.msra.mxu0 %v266_v4  ;;  %1797 = vmatprep.subr.mxu1 %v432_v35  ;;  %v554_v36 = vld [vmem:[#allocation5 + $0x38] sm:$0xff]  ;;  %v553_v39 = vld [vmem:[#allocation5 + $0x30] sm:$0xff]  ;;  %v552_v41 = vld [vmem:[#allocation5 + $0x28] sm:$0xff] }
  0x39   : > { %1745 = vmatprep.subr.mxu0 %v265_v5  ;;  %1798 = vmatpush3.msra.mxu1 %v432_v35  ;;  %v551_v43 = vld [vmem:[#allocation5 + $0x20] sm:$0xff]  ;;  %v672_v45 = vld [vmem:[#allocation5 + $0x58] sm:$0xff]  ;;  %v671_v47 = vld [vmem:[#allocation5 + $0x50] sm:$0xff] }
  0x3a   : > { %1746 = vmatpush3.msra.mxu0 %v265_v5  ;;  %1805 = vmatprep.subr.mxu1 %v554_v36  ;;  %v670_v49 = vld [vmem:[#allocation5 + $0x48] sm:$0xff]  ;;  %v669_v51 = vld [vmem:[#allocation5 + $0x40] sm:$0xff]  ;;  %v790_v53 = vld [vmem:[#allocation5 + $0x78] sm:$0xff] }
  0x3b   : > { %1747 = vmatprep.subr.mxu0 %v264_v6  ;;  %v789_v55 = vld [vmem:[#allocation5 + $0x70] sm:$0xff]  ;;  %v788_v57 = vld [vmem:[#allocation5 + $0x68] sm:$0xff]  ;;  %v787_v59 = vld [vmem:[#allocation5 + $0x60] sm:$0xff]  ;;  %1944 = vset.pattern.permute.xlu0 %v2019_v3 }
  0x3c   : > { %1748 = vmatpush3.msra.mxu0 %v264_v6  ;;  %v921_v1 = vld [vmem:[%s2639_s3 + $0x8] sm:$0xff]  ;;  %v1018_v4 = vld [vmem:[%s2640_s4 + $0x10] sm:$0xff]  ;;  %v1016_v5 = vld [vmem:[%s2640_s4] sm:$0xff] }
  0x3d   : > { %1749 = vmatprep.subr.mxu0 %v263_v7  ;;  %v953_v2 = vld [vmem:[%s2639_s3 + $0x108] sm:$0xff]  ;;  %1060 = vperm.xlu1 %1945, %v1018_v4   ;;  %v1019_v6 = vld [vmem:[%s2640_s4 + $0x18] sm:$0xff] }
  0x3e   : > { %1750 = vmatpush3.msra.mxu0 %v263_v7  ;;  %1050 = vperm.xlu0 %1944, %v1016_v5   ;;  %v1017_v7 = vld [vmem:[%s2640_s4 + $0x8] sm:$0xff]  ;;  %v1027_v19 = vld [vmem:[%s2640_s4 + $0x58] sm:$0xff]  ;;  %v1038_v5 = vld [vmem:[%s2640_s4 + $0xb0] sm:$0xff] }
  0x3f   : > { %1751 = vmatprep.subr.mxu0 %v262_v8  ;;  %v1031_v35 = vld [vmem:[%s2640_s4 + $0x78] sm:$0xff] }
  0x40   : > { %1752 = vmatpush3.msra.mxu0 %v262_v8  ;;  %v1021_v8 = vld [vmem:[%s2640_s4 + $0x28] sm:$0xff]  ;;  %v1039_v4 = vld [vmem:[%s2640_s4 + $0xb8] sm:$0xff] }
  0x41   : > { %1753 = vmatprep.subr.mxu0 %v261_v9  ;;  %1065 = vperm.xlu1 %1945, %v1019_v6  }
  0x42   : > { %1754 = vmatpush3.msra.mxu0 %v261_v9  ;;  %1055 = vperm.xlu0 %1944, %v1017_v7   ;;  %v1020_v9 = vld [vmem:[%s2640_s4 + $0x20] sm:$0xff] }
  0x43   : > { %1755 = vmatprep.subr.mxu0 %v260_v10 }
  0x44   : > { %1756 = vmatpush3.msra.mxu0 %v260_v10  ;;  %v1023_v10 = vld [vmem:[%s2640_s4 + $0x38] sm:$0xff] }
  0x45   : > { %1757 = vmatprep.subr.mxu0 %v259_v11  ;;  %1075 = vperm.xlu1 %1945, %v1021_v8  }
  0x46   : > { %1758 = vmatpush3.msra.mxu0 %v259_v11  ;;  %1070 = vperm.xlu0 %1944, %v1020_v9   ;;  %v1022_v11 = vld [vmem:[%s2640_s4 + $0x30] sm:$0xff] }
  0x47   : > { %1759 = vmatprep.subr.mxu0 %v258_v12 }
  0x48   : > { %1760 = vmatpush3.msra.mxu0 %v258_v12  ;;  %v1025_v12 = vld [vmem:[%s2640_s4 + $0x48] sm:$0xff] }
  0x49   : > { %1761 = vmatprep.subr.mxu0 %v257_v13  ;;  %1085 = vperm.xlu1 %1945, %v1023_v10  }
  0x4a   : > { %1762 = vmatpush3.msra.mxu0 %v257_v13  ;;  %1080 = vperm.xlu0 %1944, %v1022_v11   ;;  %v1024_v13 = vld [vmem:[%s2640_s4 + $0x40] sm:$0xff] }
  0x4b   : > { %1763 = vmatprep.subr.mxu0 %v256_v14 }
  0x4c   : > { %1764 = vmatpush3.msra.mxu0 %v256_v14 }
  0x4d   : > { %1765 = vmatprep.subr.mxu0 %v255_v15  ;;  %1095 = vperm.xlu1 %1945, %v1025_v12   ;;  %v1041_v12 = vld [vmem:[%s2640_s4 + $0xc8] sm:$0xff] }
  0x4e   : > { %1766 = vmatpush3.msra.mxu0 %v255_v15  ;;  %1090 = vperm.xlu0 %1944, %v1024_v13   ;;  %v1040_v13 = vld [vmem:[%s2640_s4 + $0xc0] sm:$0xff] }
  0x4f   : > { %1768 = vmatmul.mubr.f32.vlgmr.msra.gmra.mxu0 %v272_v20  ;;  %1208 = vmatprep.subr.mxu0 %v2018_v0  ;;  %v1026_v20 = vld [vmem:[%s2640_s4 + $0x50] sm:$0xff] }
  0x50   : > { %1770 = vmatprep.mubr.f32.mxu0 %v273_v21 }
  0x51   : > { %1105 = vperm.xlu1 %1945, %v1027_v19  }
  0x52   : > { %1100 = vperm.xlu0 %1944, %v1026_v20  }
  0x53   : > { %1771 = vmatmul.mubr.f32.gmra.mxu0 %v274_v22 }
  0x54   : > { %1773 = vmatprep.mubr.f32.mxu0 %v275_v23 }
  0x57   : > { %1774 = vmatmul.mubr.f32.gmra.mxu0 %v276_v24 }
  0x58   : > { %1776 = vmatprep.mubr.f32.mxu0 %v277_v25 }
  0x5b   : > { %1777 = vmatmul.mubr.f32.gmra.mxu0 %v278_v26 }
  0x5c   : > { %1779 = vmatprep.mubr.f32.mxu0 %v279_v27  ;;  %v1029_v27 = vld [vmem:[%s2640_s4 + $0x68] sm:$0xff] }
  0x5d   : > { %1115 = vperm.xlu1 %1945, %v1029_v27  }
  0x5f   : > { %1780 = vmatmul.mubr.f32.gmra.mxu0 %v280_v28  ;;  %v1028_v28 = vld [vmem:[%s2640_s4 + $0x60] sm:$0xff] }
  0x60   : > { %1782 = vmatprep.mubr.f32.mxu0 %v281_v29  ;;  %1110 = vperm.xlu0 %1944, %v1028_v28  }
  0x61   : > { %1125 = vperm.xlu1 %1945, %v1031_v35   ;;  %v1013_v35 = vld [vmem:[#allocation2 + $0xe8] sm:$0xff] }
  0x63   : > { %1783 = vmatmul.mubr.f32.gmra.mxu0 %v282_v30 }
  0x64   : > { %1785 = vmatprep.mubr.f32.mxu0 %v283_v31 }
  0x67   : > { %1786 = vmatmul.mubr.f32.gmra.mxu0 %v284_v32 }
  0x68   : > { %1788 = vmatprep.mubr.f32.mxu0 %v285_v33 }
  0x6b   : > { %1789 = vmatmul.mubr.f32.gmra.mxu0 %v286_v34 }
  0x6c   : > { %1272 = vmatprep.mubr.f32.mxu0 %v921_v1 }
 0x10f   : > { %v1769_v37 = vpop.f32.mrf.mxu0 }
 0x111   : > { %v353_v38 = vpop.f32.mrf.mxu0 }
 0x112   : > { %1799 = vmatprep.mubr.msk.f32.mxu1 %vm436_vm0, %v353_v38 }
 0x113   : > { %v1772_v40 = vpop.f32.mrf.mxu0  ;;  %1800 = vmatmul.mubr.msk.f32.vlgmr.msra.gmra.mxu1 %vm436_vm0, %v1769_v37 }
 0x114   : > { %1806 = vmatpush3.msra.mxu1 %v554_v36  ;;  %v1030_v36 = vld [vmem:[%s2640_s4 + $0x70] sm:$0xff] }
 0x115   : > { %1807 = vmatprep.subr.mxu1 %v553_v39  ;;  %v363_v42 = vpop.f32.mrf.mxu0  ;;  %1120 = vperm.xlu0 %1944, %v1030_v36   ;;  %v1012_v36 = vld [vmem:[#allocation2 + $0xe0] sm:$0xff] }
 0x116   : > { %1808 = vmatpush3.msra.mxu1 %v553_v39  ;;  %1802 = vmatprep.mubr.msk.f32.mxu1 %vm436_vm0, %v363_v42 }
 0x117   : > { %1809 = vmatprep.subr.mxu1 %v552_v41  ;;  %v1775_v44 = vpop.f32.mrf.mxu0  ;;  %1803 = vmatmul.mubr.msk.f32.gmra.mxu1 %vm436_vm0, %v1772_v40 }
 0x118   : > { %1810 = vmatpush3.msra.mxu1 %v552_v41 }
 0x119   : > { %1811 = vmatprep.subr.mxu1 %v551_v43  ;;  %v373_v46 = vpop.f32.mrf.mxu0 }
 0x11a   : > { %1812 = vmatpush3.msra.mxu1 %v551_v43  ;;  %1813 = vmatprep.mubr.msk.f32.mxu1 %vm436_vm0, %v373_v46  ;;  %v1033_v43 = vld [vmem:[%s2640_s4 + $0x88] sm:$0xff] }
 0x11b   : > { %1819 = vmatprep.subr.mxu1 %v672_v45  ;;  %v1778_v48 = vpop.f32.mrf.mxu0  ;;  %1814 = vmatmul.mubr.msk.f32.vlgmr.msra.gmra.mxu1 %vm436_vm0, %v1775_v44  ;;  %v1032_v44 = vld [vmem:[%s2640_s4 + $0x80] sm:$0xff] }
 0x11c   : > { %1820 = vmatpush3.msra.mxu1 %v672_v45  ;;  %1135 = vperm.xlu1 %1945, %v1033_v43   ;;  %v1005_v43 = vld [vmem:[#allocation2 + $0xa8] sm:$0xff] }
 0x11d   : > { %1821 = vmatprep.subr.mxu1 %v671_v47  ;;  %v383_v50 = vpop.f32.mrf.mxu0  ;;  %1130 = vperm.xlu0 %1944, %v1032_v44   ;;  %v1004_v44 = vld [vmem:[#allocation2 + $0xa0] sm:$0xff] }
 0x11e   : > { %1822 = vmatpush3.msra.mxu1 %v671_v47  ;;  %1816 = vmatprep.mubr.msk.f32.mxu1 %vm436_vm0, %v383_v50 }
 0x11f   : > { %1823 = vmatprep.subr.mxu1 %v670_v49  ;;  %v1781_v52 = vpop.f32.mrf.mxu0  ;;  %1817 = vmatmul.mubr.msk.f32.gmra.mxu1 %vm436_vm0, %v1778_v48 }
 0x120   : > { %1824 = vmatpush3.msra.mxu1 %v670_v49 }
 0x121   : > { %1825 = vmatprep.subr.mxu1 %v669_v51  ;;  %v393_v54 = vpop.f32.mrf.mxu0 }
 0x122   : > { %1826 = vmatpush3.msra.mxu1 %v669_v51  ;;  %1827 = vmatprep.mubr.msk.f32.mxu1 %vm436_vm0, %v393_v54  ;;  %v1035_v51 = vld [vmem:[%s2640_s4 + $0x98] sm:$0xff] }
 0x123   : > { %1833 = vmatprep.subr.mxu1 %v790_v53  ;;  %v1784_v56 = vpop.f32.mrf.mxu0  ;;  %1828 = vmatmul.mubr.msk.f32.vlgmr.msra.gmra.mxu1 %vm436_vm0, %v1781_v52  ;;  %v1034_v52 = vld [vmem:[%s2640_s4 + $0x90] sm:$0xff] }
 0x124   : > { %1834 = vmatpush3.msra.mxu1 %v790_v53  ;;  %1145 = vperm.xlu1 %1945, %v1035_v51   ;;  %v923_v51 = vld [vmem:[%s2639_s3 + $0x18] sm:$0xff] }
 0x125   : > { %1835 = vmatprep.subr.mxu1 %v789_v55  ;;  %v403_v58 = vpop.f32.mrf.mxu0  ;;  %1140 = vperm.xlu0 %1944, %v1034_v52   ;;  %v955_v52 = vld [vmem:[%s2639_s3 + $0x118] sm:$0xff] }
 0x126   : > { %1836 = vmatpush3.msra.mxu1 %v789_v55  ;;  %1830 = vmatprep.mubr.msk.f32.mxu1 %vm436_vm0, %v403_v58 }
 0x127   : > { %1837 = vmatprep.subr.mxu1 %v788_v57  ;;  %v1787_v60 = vpop.f32.mrf.mxu0  ;;  %1831 = vmatmul.mubr.msk.f32.gmra.mxu1 %vm436_vm0, %v1784_v56 }
 0x128   : > { %1838 = vmatpush3.msra.mxu1 %v788_v57 }
 0x129   : > { %1839 = vmatprep.subr.mxu1 %v787_v59  ;;  %v413_v61 = vpop.f32.mrf.mxu0 }
 0x12a   : > { %1840 = vmatpush3.msra.mxu1 %v787_v59  ;;  %1841 = vmatprep.mubr.msk.f32.mxu1 %vm436_vm0, %v413_v61  ;;  %v1037_v59 = vld [vmem:[%s2640_s4 + $0xa8] sm:$0xff] }
 0x12b   : > { %v1790_v62 = vpop.f32.mrf.mxu0  ;;  %1842 = vmatmul.mubr.msk.f32.vlgmr.msra.gmra.mxu1 %vm436_vm0, %v1787_v60  ;;  %1847 = vmatprep.subr.mxu1 %v2018_v0  ;;  %v1036_v60 = vld [vmem:[%s2640_s4 + $0xa0] sm:$0xff] }
 0x12c   : > { %1155 = vperm.xlu1 %1945, %v1037_v59   ;;  %1150 = vperm.xlu0 %1944, %v1036_v60   ;;  %v1046_v59 = vld [vmem:[%s2640_s4 + $0xf0] sm:$0xff]  ;;  %v924_v60 = vld [vmem:[%s2639_s3 + $0x20] sm:$0xff] }
 0x12d   : > { %v423_v63 = vpop.f32.mrf.mxu0 }
 0x12e   : > { %1844 = vmatprep.mubr.msk.f32.mxu1 %vm436_vm0, %v423_v63 }
 0x12f   : > { %1845 = vmatmul.mubr.msk.f32.gmra.mxu1 %vm436_vm0, %v1790_v62 }
 0x130   : > { %1352 = vmatprep.mubr.f32.mxu1 %v953_v2  ;;  %1165 = vperm.xlu1 %1945, %v1039_v4   ;;  %v961_v4 = vld [vmem:[%s2639_s3 + $0x148] sm:$0xff] }
 0x131   : > { %1160 = vperm.xlu0 %1944, %v1038_v5   ;;  %v928_v5 = vld [vmem:[%s2639_s3 + $0x40] sm:$0xff] }
 0x134   : > { %1175 = vperm.xlu1 %1945, %v1041_v12   ;;  %v965_v12 = vld [vmem:[%s2639_s3 + $0x168] sm:$0xff] }
 0x135   : > { %1170 = vperm.xlu0 %1944, %v1040_v13   ;;  %v932_v13 = vld [vmem:[%s2639_s3 + $0x60] sm:$0xff] }
 0x1d3   : > { %v1801_v14 = vpop.f32.mrf.mxu1 }
 0x1d4   : > { %vm535_vm1 = vcmp.ge.f32.partialorder %v1801_v14, 0.0  ;;  %v539_v15 = vmul.f32 0.2, %v1801_v14 }
 0x1d5   : > { %v515_v16 = vpop.f32.mrf.mxu1 }
 0x1d6   : > { %v543_v17 = vsel %vm535_vm1, %v1801_v14, %v539_v15  ;;  %vm534_vm2 = vcmp.ge.f32.partialorder %v515_v16, 0.0  ;;  %v538_v18 = vmul.f32 0.2, %v515_v16  ;;  %v1043_v15 = vld [vmem:[%s2640_s4 + $0xd8] sm:$0xff] }
 0x1d7   : > { %547 = vst.msk [vmem:[#allocation2 + $0x8] sm:$0xff] %vm436_vm0, %v543_v17  ;;  %v1804_v21 = vpop.f32.mrf.mxu1  ;;  %1185 = vperm.xlu1 %1945, %v1043_v15   ;;  %v935_v15 = vld [vmem:[%s2639_s3 + $0x78] sm:$0xff] }
 0x1d8   : > { %v542_v22 = vsel %vm534_vm2, %v515_v16, %v538_v18  ;;  %vm537_vm3 = vcmp.ge.f32.partialorder %v1804_v21, 0.0  ;;  %v541_v23 = vmul.f32 0.2, %v1804_v21  ;;  %v1042_v16 = vld [vmem:[%s2640_s4 + $0xd0] sm:$0xff] }
 0x1d9   : > { %546 = vst.msk [vmem:[#allocation2] sm:$0xff] %vm436_vm0, %v542_v22  ;;  %v525_v24 = vpop.f32.mrf.mxu1  ;;  %1180 = vperm.xlu0 %1944, %v1042_v16   ;;  %v967_v16 = vld [vmem:[%s2639_s3 + $0x178] sm:$0xff] }
 0x1da   : > { %v545_v25 = vsel %vm537_vm3, %v1804_v21, %v541_v23  ;;  %vm536_vm4 = vcmp.ge.f32.partialorder %v525_v24, 0.0  ;;  %v540_v26 = vmul.f32 0.2, %v525_v24 }
 0x1db   : > { %549 = vst.msk [vmem:[#allocation2 + $0x18] sm:$0xff] %vm436_vm0, %v545_v25  ;;  %v1815_v29 = vpop.f32.mrf.mxu1 }
 0x1dc   : > { %v544_v30 = vsel %vm536_vm4, %v525_v24, %v540_v26  ;;  %vm653_vm5 = vcmp.ge.f32.partialorder %v1815_v29, 0.0  ;;  %v657_v31 = vmul.f32 0.2, %v1815_v29 }
 0x1dd   : > { %548 = vst.msk [vmem:[#allocation2 + $0x10] sm:$0xff] %vm436_vm0, %v544_v30  ;;  %v633_v32 = vpop.f32.mrf.mxu1 }
 0x1de   : > { %v661_v33 = vsel %vm653_vm5, %v1815_v29, %v657_v31  ;;  %vm652_vm6 = vcmp.ge.f32.partialorder %v633_v32, 0.0  ;;  %v656_v34 = vmul.f32 0.2, %v633_v32  ;;  %v985_v31 = vld [vmem:[#allocation2 + $0x8] sm:$0xff] }
 0x1df   : > { %665 = vst.msk [vmem:[#allocation2 + $0x28] sm:$0xff] %vm436_vm0, %v661_v33  ;;  %v1818_v37 = vpop.f32.mrf.mxu1  ;;  %v1015_v33 = vld [vmem:[#allocation2 + $0xf8] sm:$0xff] }
 0x1e0   : > { %v660_v38 = vsel %vm652_vm6, %v633_v32, %v656_v34  ;;  %vm655_vm7 = vcmp.ge.f32.partialorder %v1818_v37, 0.0  ;;  %v659_v39 = vmul.f32 0.2, %v1818_v37  ;;  %v984_v32 = vld [vmem:[#allocation2] sm:$0xff]  ;;  %v1014_v34 = vld [vmem:[#allocation2 + $0xf0] sm:$0xff] }
 0x1e1   : > { %664 = vst.msk [vmem:[#allocation2 + $0x20] sm:$0xff] %vm436_vm0, %v660_v38  ;;  %v643_v40 = vpop.f32.mrf.mxu1  ;;  %v1010_v38 = vld [vmem:[#allocation2 + $0xd0] sm:$0xff] }
 0x1e2   : > { %v663_v41 = vsel %vm655_vm7, %v1818_v37, %v659_v39  ;;  %vm654_vm8 = vcmp.ge.f32.partialorder %v643_v40, 0.0  ;;  %v658_v42 = vmul.f32 0.2, %v643_v40  ;;  %v987_v29 = vld [vmem:[#allocation2 + $0x18] sm:$0xff]  ;;  %v1009_v39 = vld [vmem:[#allocation2 + $0xc8] sm:$0xff] }
 0x1e3   : > { %667 = vst.msk [vmem:[#allocation2 + $0x38] sm:$0xff] %vm436_vm0, %v663_v41  ;;  %v1829_v45 = vpop.f32.mrf.mxu1  ;;  %v1011_v37 = vld [vmem:[#allocation2 + $0xd8] sm:$0xff] }
 0x1e4   : > { %v662_v46 = vsel %vm654_vm8, %v643_v40, %v658_v42  ;;  %vm771_vm9 = vcmp.ge.f32.partialorder %v1829_v45, 0.0  ;;  %v775_v47 = vmul.f32 0.2, %v1829_v45  ;;  %v986_v30 = vld [vmem:[#allocation2 + $0x10] sm:$0xff]  ;;  %v1008_v40 = vld [vmem:[#allocation2 + $0xc0] sm:$0xff]  ;;  %v1007_v41 = vld [vmem:[#allocation2 + $0xb8] sm:$0xff] }
 0x1e5   : > { %666 = vst.msk [vmem:[#allocation2 + $0x30] sm:$0xff] %vm436_vm0, %v662_v46  ;;  %v751_v48 = vpop.f32.mrf.mxu1  ;;  %v1006_v42 = vld [vmem:[#allocation2 + $0xb0] sm:$0xff] }
 0x1e6   : > { %v779_v49 = vsel %vm771_vm9, %v1829_v45, %v775_v47  ;;  %vm770_vm10 = vcmp.ge.f32.partialorder %v751_v48, 0.0  ;;  %v774_v50 = vmul.f32 0.2, %v751_v48  ;;  %v989_v27 = vld [vmem:[#allocation2 + $0x28] sm:$0xff]  ;;  %v1003_v45 = vld [vmem:[#allocation2 + $0x98] sm:$0xff]  ;;  %v1002_v46 = vld [vmem:[#allocation2 + $0x90] sm:$0xff] }
 0x1e7   : > { %783 = vst.msk [vmem:[#allocation2 + $0x48] sm:$0xff] %vm436_vm0, %v779_v49  ;;  %v1832_v53 = vpop.f32.mrf.mxu1  ;;  %v1001_v47 = vld [vmem:[#allocation2 + $0x88] sm:$0xff]  ;;  %v920_v49 = vld [vmem:[%s2639_s3] sm:$0xff] }
 0x1e8   : > { %v778_v54 = vsel %vm770_vm10, %v751_v48, %v774_v50  ;;  %vm773_vm11 = vcmp.ge.f32.partialorder %v1832_v53, 0.0  ;;  %v777_v55 = vmul.f32 0.2, %v1832_v53  ;;  %v988_v28 = vld [vmem:[#allocation2 + $0x20] sm:$0xff] }
 0x1e9   : > { %782 = vst.msk [vmem:[#allocation2 + $0x40] sm:$0xff] %vm436_vm0, %v778_v54  ;;  %v761_v56 = vpop.f32.mrf.mxu1  ;;  %v1000_v48 = vld [vmem:[#allocation2 + $0x80] sm:$0xff] }
 0x1ea   : > { %v781_v57 = vsel %vm773_vm11, %v1832_v53, %v777_v55  ;;  %vm772_vm12 = vcmp.ge.f32.partialorder %v761_v56, 0.0  ;;  %v776_v58 = vmul.f32 0.2, %v761_v56  ;;  %v991_v25 = vld [vmem:[#allocation2 + $0x38] sm:$0xff]  ;;  %v952_v50 = vld [vmem:[%s2639_s3 + $0x100] sm:$0xff]  ;;  %v1045_v53 = vld [vmem:[%s2640_s4 + $0xe8] sm:$0xff] }
 0x1eb   : > { %785 = vst.msk [vmem:[#allocation2 + $0x58] sm:$0xff] %vm436_vm0, %v781_v57  ;;  %v1843_v61 = vpop.f32.mrf.mxu1  ;;  %v1044_v54 = vld [vmem:[%s2640_s4 + $0xe0] sm:$0xff]  ;;  %v954_v55 = vld [vmem:[%s2639_s3 + $0x110] sm:$0xff]  ;;  %v957_v57 = vld [vmem:[%s2639_s3 + $0x128] sm:$0xff]  ;;  %1195 = vperm.xlu1 %1945, %v1045_v53  }
 0x1ec   : > { %v780_v62 = vsel %vm772_vm12, %v761_v56, %v776_v58  ;;  %vm889_vm13 = vcmp.ge.f32.partialorder %v1843_v61, 0.0  ;;  %v893_v63 = vmul.f32 0.2, %v1843_v61  ;;  %v990_v26 = vld [vmem:[#allocation2 + $0x30] sm:$0xff]  ;;  %v925_v56 = vld [vmem:[%s2639_s3 + $0x28] sm:$0xff]  ;;  %1190 = vperm.xlu0 %1944, %v1044_v54   ;;  %v1047_v58 = vld [vmem:[%s2640_s4 + $0xf8] sm:$0xff] }
 0x1ed   : > { %784 = vst.msk [vmem:[#allocation2 + $0x50] sm:$0xff] %vm436_vm0, %v780_v62  ;;  %v869_v1 = vpop.f32.mrf.mxu1  ;;  %v927_v62 = vld [vmem:[%s2639_s3 + $0x38] sm:$0xff] }
 0x1ee   : > { %v897_v2 = vsel %vm889_vm13, %v1843_v61, %v893_v63  ;;  %vm888_vm14 = vcmp.ge.f32.partialorder %v869_v1, 0.0  ;;  %v892_v3 = vmul.f32 0.2, %v869_v1  ;;  %v993_v23 = vld [vmem:[#allocation2 + $0x48] sm:$0xff]  ;;  %v956_v61 = vld [vmem:[%s2639_s3 + $0x120] sm:$0xff]  ;;  %v959_v63 = vld [vmem:[%s2639_s3 + $0x138] sm:$0xff] }
 0x1ef   : > { %901 = vst.msk [vmem:[#allocation2 + $0x68] sm:$0xff] %vm436_vm0, %v897_v2  ;;  %v1846_v6 = vpop.f32.mrf.mxu1  ;;  %1205 = vperm.xlu1 %1945, %v1047_v58   ;;  %v958_v2 = vld [vmem:[%s2639_s3 + $0x130] sm:$0xff] }
 0x1f0   : > { %v896_v7 = vsel %vm888_vm14, %v869_v1, %v892_v3  ;;  %vm891_vm15 = vcmp.ge.f32.partialorder %v1846_v6, 0.0  ;;  %v895_v8 = vmul.f32 0.2, %v1846_v6  ;;  %v992_v24 = vld [vmem:[#allocation2 + $0x40] sm:$0xff]  ;;  %1200 = vperm.xlu0 %1944, %v1046_v59   ;;  %v926_v1 = vld [vmem:[%s2639_s3 + $0x30] sm:$0xff]  ;;  %v929_v3 = vld [vmem:[%s2639_s3 + $0x48] sm:$0xff] }
 0x1f1   : > { %900 = vst.msk [vmem:[#allocation2 + $0x60] sm:$0xff] %vm436_vm0, %v896_v7  ;;  %v879_v9 = vpop.f32.mrf.mxu1  ;;  %v931_v7 = vld [vmem:[%s2639_s3 + $0x58] sm:$0xff] }
 0x1f2   : > { %v899_v10 = vsel %vm891_vm15, %v1846_v6, %v895_v8  ;;  %vm890_vm1 = vcmp.ge.f32.partialorder %v879_v9, 0.0  ;;  %v894_v11 = vmul.f32 0.2, %v879_v9  ;;  %v995_v21 = vld [vmem:[#allocation2 + $0x58] sm:$0xff]  ;;  %v960_v6 = vld [vmem:[%s2639_s3 + $0x140] sm:$0xff] }
 0x1f3   : > { %903 = vst.msk [vmem:[#allocation2 + $0x78] sm:$0xff] %vm436_vm0, %v899_v10  ;;  %v963_v8 = vld [vmem:[%s2639_s3 + $0x158] sm:$0xff]  ;;  %v962_v10 = vld [vmem:[%s2639_s3 + $0x150] sm:$0xff] }
 0x1f4   : > { %v898_v14 = vsel %vm890_vm1, %v879_v9, %v894_v11  ;;  %v994_v22 = vld [vmem:[#allocation2 + $0x50] sm:$0xff]  ;;  %v933_v11 = vld [vmem:[%s2639_s3 + $0x68] sm:$0xff] }
 0x1f5   : > { %902 = vst.msk [vmem:[#allocation2 + $0x70] sm:$0xff] %vm436_vm0, %v898_v14  ;;  %v930_v9 = vld [vmem:[%s2639_s3 + $0x50] sm:$0xff]  ;;  %v964_v14 = vld [vmem:[%s2639_s3 + $0x160] sm:$0xff] }
 0x1f6   : > { %v997_v19 = vld [vmem:[#allocation2 + $0x68] sm:$0xff] }
 0x1f8   : > { %v996_v20 = vld [vmem:[#allocation2 + $0x60] sm:$0xff] }
 0x1fa   : > { %v999_v17 = vld [vmem:[#allocation2 + $0x78] sm:$0xff] }
 0x1fb   : > { %1209 = vmatpush1.msra.mxu0 %v999_v17  ;;  %1879 = vmatpush1.msra.mxu1 %v999_v17  ;;  %v934_v17 = vld [vmem:[%s2639_s3 + $0x70] sm:$0xff] }
 0x1fc   : > { %1210 = vmatprep.subr.mxu0 %v2018_v0  ;;  %1848 = vmatprep.subr.mxu1 %v2018_v0  ;;  %v998_v18 = vld [vmem:[#allocation2 + $0x70] sm:$0xff] }
 0x1fd   : > { %1211 = vmatpush1.msra.mxu0 %v998_v18  ;;  %1880 = vmatpush1.msra.mxu1 %v998_v18  ;;  %v966_v18 = vld [vmem:[%s2639_s3 + $0x170] sm:$0xff] }
 0x1fe   : > { %1212 = vmatprep.subr.mxu0 %v2018_v0  ;;  %1849 = vmatprep.subr.mxu1 %v2018_v0 }
 0x1ff   : > { %1213 = vmatpush1.msra.mxu0 %v997_v19  ;;  %1881 = vmatpush1.msra.mxu1 %v997_v19  ;;  %v937_v19 = vld [vmem:[%s2639_s3 + $0x88] sm:$0xff] }
 0x200   : > { %1214 = vmatprep.subr.mxu0 %v2018_v0  ;;  %1850 = vmatprep.subr.mxu1 %v2018_v0 }
 0x201   : > { %1215 = vmatpush1.msra.mxu0 %v996_v20  ;;  %1882 = vmatpush1.msra.mxu1 %v996_v20  ;;  %v969_v20 = vld [vmem:[%s2639_s3 + $0x188] sm:$0xff] }
 0x202   : > { %1216 = vmatprep.subr.mxu0 %v2018_v0  ;;  %1851 = vmatprep.subr.mxu1 %v2018_v0 }
 0x203   : > { %1217 = vmatpush1.msra.mxu0 %v995_v21  ;;  %1883 = vmatpush1.msra.mxu1 %v995_v21  ;;  %v936_v21 = vld [vmem:[%s2639_s3 + $0x80] sm:$0xff] }
 0x204   : > { %1218 = vmatprep.subr.mxu0 %v2018_v0  ;;  %1852 = vmatprep.subr.mxu1 %v2018_v0 }
 0x205   : > { %1219 = vmatpush1.msra.mxu0 %v994_v22  ;;  %1884 = vmatpush1.msra.mxu1 %v994_v22  ;;  %v968_v22 = vld [vmem:[%s2639_s3 + $0x180] sm:$0xff] }
 0x206   : > { %1220 = vmatprep.subr.mxu0 %v2018_v0  ;;  %1853 = vmatprep.subr.mxu1 %v2018_v0 }
 0x207   : > { %1221 = vmatpush1.msra.mxu0 %v993_v23  ;;  %1885 = vmatpush1.msra.mxu1 %v993_v23  ;;  %v939_v23 = vld [vmem:[%s2639_s3 + $0x98] sm:$0xff] }
 0x208   : > { %1222 = vmatprep.subr.mxu0 %v2018_v0  ;;  %1854 = vmatprep.subr.mxu1 %v2018_v0 }
 0x209   : > { %1223 = vmatpush1.msra.mxu0 %v992_v24  ;;  %1886 = vmatpush1.msra.mxu1 %v992_v24  ;;  %v971_v24 = vld [vmem:[%s2639_s3 + $0x198] sm:$0xff] }
 0x20a   : > { %1224 = vmatprep.subr.mxu0 %v2018_v0  ;;  %1855 = vmatprep.subr.mxu1 %v2018_v0 }
 0x20b   : > { %1225 = vmatpush1.msra.mxu0 %v991_v25  ;;  %1887 = vmatpush1.msra.mxu1 %v991_v25  ;;  %v938_v25 = vld [vmem:[%s2639_s3 + $0x90] sm:$0xff] }
 0x20c   : > { %1226 = vmatprep.subr.mxu0 %v2018_v0  ;;  %1856 = vmatprep.subr.mxu1 %v2018_v0 }
 0x20d   : > { %1227 = vmatpush1.msra.mxu0 %v990_v26  ;;  %1888 = vmatpush1.msra.mxu1 %v990_v26  ;;  %v970_v26 = vld [vmem:[%s2639_s3 + $0x190] sm:$0xff] }
 0x20e   : > { %1228 = vmatprep.subr.mxu0 %v2018_v0  ;;  %1857 = vmatprep.subr.mxu1 %v2018_v0 }
 0x20f   : > { %1229 = vmatpush1.msra.mxu0 %v989_v27  ;;  %1889 = vmatpush1.msra.mxu1 %v989_v27  ;;  %v941_v27 = vld [vmem:[%s2639_s3 + $0xa8] sm:$0xff] }
 0x210   : > { %1230 = vmatprep.subr.mxu0 %v2018_v0  ;;  %1858 = vmatprep.subr.mxu1 %v2018_v0 }
 0x211   : > { %1231 = vmatpush1.msra.mxu0 %v988_v28  ;;  %1890 = vmatpush1.msra.mxu1 %v988_v28  ;;  %v973_v28 = vld [vmem:[%s2639_s3 + $0x1a8] sm:$0xff] }
 0x212   : > { %1232 = vmatprep.subr.mxu0 %v2018_v0  ;;  %1859 = vmatprep.subr.mxu1 %v2018_v0 }
 0x213   : > { %1233 = vmatpush1.msra.mxu0 %v987_v29  ;;  %1891 = vmatpush1.msra.mxu1 %v987_v29  ;;  %v940_v29 = vld [vmem:[%s2639_s3 + $0xa0] sm:$0xff] }
 0x214   : > { %1234 = vmatprep.subr.mxu0 %v2018_v0  ;;  %1860 = vmatprep.subr.mxu1 %v2018_v0 }
 0x215   : > { %1235 = vmatpush1.msra.mxu0 %v986_v30  ;;  %1892 = vmatpush1.msra.mxu1 %v986_v30  ;;  %v972_v30 = vld [vmem:[%s2639_s3 + $0x1a0] sm:$0xff] }
 0x216   : > { %1236 = vmatprep.subr.mxu0 %v2018_v0  ;;  %1861 = vmatprep.subr.mxu1 %v2018_v0 }
 0x217   : > { %1237 = vmatpush1.msra.mxu0 %v985_v31  ;;  %1893 = vmatpush1.msra.mxu1 %v985_v31  ;;  %v943_v31 = vld [vmem:[%s2639_s3 + $0xb8] sm:$0xff] }
 0x218   : > { %1238 = vmatprep.subr.mxu0 %v2018_v0  ;;  %1862 = vmatprep.subr.mxu1 %v2018_v0 }
 0x219   : > { %1239 = vmatpush1.msra.mxu0 %v984_v32  ;;  %1894 = vmatpush1.msra.mxu1 %v984_v32  ;;  %v975_v32 = vld [vmem:[%s2639_s3 + $0x1b8] sm:$0xff] }
 0x21a   : > { %1240 = vmatprep.subr.mxu0 %v2018_v0  ;;  %1863 = vmatprep.subr.mxu1 %v2018_v0 }
 0x21b   : > { %1241 = vmatpush2.msra.mxu0 %v1015_v33  ;;  %1895 = vmatpush2.msra.mxu1 %v1015_v33  ;;  %v942_v33 = vld [vmem:[%s2639_s3 + $0xb0] sm:$0xff] }
 0x21c   : > { %1242 = vmatprep.subr.mxu0 %v2018_v0  ;;  %1864 = vmatprep.subr.mxu1 %v2018_v0 }
 0x21d   : > { %1243 = vmatpush2.msra.mxu0 %v1014_v34  ;;  %1896 = vmatpush2.msra.mxu1 %v1014_v34  ;;  %v974_v34 = vld [vmem:[%s2639_s3 + $0x1b0] sm:$0xff] }
 0x21e   : > { %1244 = vmatprep.subr.mxu0 %v2018_v0  ;;  %1865 = vmatprep.subr.mxu1 %v2018_v0 }
 0x21f   : > { %1245 = vmatpush2.msra.mxu0 %v1013_v35  ;;  %1897 = vmatpush2.msra.mxu1 %v1013_v35  ;;  %v945_v35 = vld [vmem:[%s2639_s3 + $0xc8] sm:$0xff] }
 0x220   : > { %1246 = vmatprep.subr.mxu0 %v2018_v0  ;;  %1866 = vmatprep.subr.mxu1 %v2018_v0 }
 0x221   : > { %1247 = vmatpush2.msra.mxu0 %v1012_v36  ;;  %1898 = vmatpush2.msra.mxu1 %v1012_v36  ;;  %v977_v36 = vld [vmem:[%s2639_s3 + $0x1c8] sm:$0xff] }
 0x222   : > { %1248 = vmatprep.subr.mxu0 %v2018_v0  ;;  %1867 = vmatprep.subr.mxu1 %v2018_v0 }
 0x223   : > { %1249 = vmatpush2.msra.mxu0 %v1011_v37  ;;  %1899 = vmatpush2.msra.mxu1 %v1011_v37  ;;  %v944_v37 = vld [vmem:[%s2639_s3 + $0xc0] sm:$0xff] }
 0x224   : > { %1250 = vmatprep.subr.mxu0 %v2018_v0  ;;  %1868 = vmatprep.subr.mxu1 %v2018_v0 }
 0x225   : > { %1251 = vmatpush2.msra.mxu0 %v1010_v38  ;;  %1900 = vmatpush2.msra.mxu1 %v1010_v38  ;;  %v976_v38 = vld [vmem:[%s2639_s3 + $0x1c0] sm:$0xff] }
 0x226   : > { %1252 = vmatprep.subr.mxu0 %v2018_v0  ;;  %1869 = vmatprep.subr.mxu1 %v2018_v0 }
 0x227   : > { %1253 = vmatpush2.msra.mxu0 %v1009_v39  ;;  %1901 = vmatpush2.msra.mxu1 %v1009_v39  ;;  %v947_v39 = vld [vmem:[%s2639_s3 + $0xd8] sm:$0xff] }
 0x228   : > { %1254 = vmatprep.subr.mxu0 %v2018_v0  ;;  %1870 = vmatprep.subr.mxu1 %v2018_v0 }
 0x229   : > { %1255 = vmatpush2.msra.mxu0 %v1008_v40  ;;  %1902 = vmatpush2.msra.mxu1 %v1008_v40  ;;  %v979_v40 = vld [vmem:[%s2639_s3 + $0x1d8] sm:$0xff] }
 0x22a   : > { %1256 = vmatprep.subr.mxu0 %v2018_v0  ;;  %1871 = vmatprep.subr.mxu1 %v2018_v0 }
 0x22b   : > { %1257 = vmatpush2.msra.mxu0 %v1007_v41  ;;  %1903 = vmatpush2.msra.mxu1 %v1007_v41  ;;  %v946_v41 = vld [vmem:[%s2639_s3 + $0xd0] sm:$0xff] }
 0x22c   : > { %1258 = vmatprep.subr.mxu0 %v2018_v0  ;;  %1872 = vmatprep.subr.mxu1 %v2018_v0 }
 0x22d   : > { %1259 = vmatpush2.msra.mxu0 %v1006_v42  ;;  %1904 = vmatpush2.msra.mxu1 %v1006_v42  ;;  %v978_v42 = vld [vmem:[%s2639_s3 + $0x1d0] sm:$0xff] }
 0x22e   : > { %1260 = vmatprep.subr.mxu0 %v2018_v0  ;;  %1873 = vmatprep.subr.mxu1 %v2018_v0 }
 0x22f   : > { %1261 = vmatpush2.msra.mxu0 %v1005_v43  ;;  %1905 = vmatpush2.msra.mxu1 %v1005_v43  ;;  %v949_v43 = vld [vmem:[%s2639_s3 + $0xe8] sm:$0xff] }
 0x230   : > { %1262 = vmatprep.subr.mxu0 %v2018_v0  ;;  %1874 = vmatprep.subr.mxu1 %v2018_v0 }
 0x231   : > { %1263 = vmatpush2.msra.mxu0 %v1004_v44  ;;  %1906 = vmatpush2.msra.mxu1 %v1004_v44  ;;  %v981_v44 = vld [vmem:[%s2639_s3 + $0x1e8] sm:$0xff] }
 0x232   : > { %1264 = vmatprep.subr.mxu0 %v2018_v0  ;;  %1875 = vmatprep.subr.mxu1 %v2018_v0 }
 0x233   : > { %1265 = vmatpush2.msra.mxu0 %v1003_v45  ;;  %1907 = vmatpush2.msra.mxu1 %v1003_v45  ;;  %v948_v45 = vld [vmem:[%s2639_s3 + $0xe0] sm:$0xff] }
 0x234   : > { %1266 = vmatprep.subr.mxu0 %v2018_v0  ;;  %1876 = vmatprep.subr.mxu1 %v2018_v0 }
 0x235   : > { %1267 = vmatpush2.msra.mxu0 %v1002_v46  ;;  %1908 = vmatpush2.msra.mxu1 %v1002_v46  ;;  %v980_v46 = vld [vmem:[%s2639_s3 + $0x1e0] sm:$0xff] }
 0x236   : > { %1268 = vmatprep.subr.mxu0 %v2018_v0  ;;  %1877 = vmatprep.subr.mxu1 %v2018_v0 }
 0x237   : > { %1269 = vmatpush2.msra.mxu0 %v1001_v47  ;;  %1909 = vmatpush2.msra.mxu1 %v1001_v47  ;;  %v951_v47 = vld [vmem:[%s2639_s3 + $0xf8] sm:$0xff] }
 0x238   : > { %1270 = vmatprep.subr.mxu0 %v2018_v0  ;;  %1878 = vmatprep.subr.mxu1 %v2018_v0  ;;  %v922_v0 = vld [vmem:[%s2639_s3 + $0x10] sm:$0xff] }
 0x239   : > { %1271 = vmatpush2.msra.mxu0 %v1000_v48  ;;  %1910 = vmatpush2.msra.mxu1 %v1000_v48  ;;  %v983_v48 = vld [vmem:[%s2639_s3 + $0x1f8] sm:$0xff] }
 0x23a   : > { %1273 = vmatmul.mubr.f32.vlgmr.msra.gmra.mxu0 %v920_v49  ;;  %1353 = vmatmul.mubr.f32.vlgmr.msra.gmra.mxu1 %v952_v50  ;;  %v950_v49 = vld [vmem:[%s2639_s3 + $0xf0] sm:$0xff] }
 0x23b   : > { %1277 = vmatprep.mubr.f32.mxu0 %v923_v51  ;;  %1357 = vmatprep.mubr.f32.mxu1 %v955_v52  ;;  %v982_v50 = vld [vmem:[%s2639_s3 + $0x1f0] sm:$0xff]  ;;  %v1051_v51 = vpop.permute.xlu0 %1050  ;;  %v1061_v52 = vpop.permute.xlu1 %1060 }
 0x23e   : > { %1278 = vmatmul.mubr.f32.gmra.mxu0 %v922_v0  ;;  %1358 = vmatmul.mubr.f32.gmra.mxu1 %v954_v55 }
 0x23f   : > { %1282 = vmatprep.mubr.f32.mxu0 %v925_v56  ;;  %1362 = vmatprep.mubr.f32.mxu1 %v957_v57  ;;  %v1056_v53 = vpop.permute.xlu0 %1055  ;;  %v1066_v54 = vpop.permute.xlu1 %1065 }
 0x242   : > { %1283 = vmatmul.mubr.f32.gmra.mxu0 %v924_v60  ;;  %1363 = vmatmul.mubr.f32.gmra.mxu1 %v956_v61 }
 0x243   : > { %1287 = vmatprep.mubr.f32.mxu0 %v927_v62  ;;  %1367 = vmatprep.mubr.f32.mxu1 %v959_v63  ;;  %v2527_v0 = vpop.permute.xlu0 %1070  ;;  %v2529_v55 = vpop.permute.xlu1 %1075 }
 0x246   : > { %1288 = vmatmul.mubr.f32.gmra.mxu0 %v926_v1  ;;  %1368 = vmatmul.mubr.f32.gmra.mxu1 %v958_v2 }
 0x247   : > { %1292 = vmatprep.mubr.f32.mxu0 %v929_v3  ;;  %1372 = vmatprep.mubr.f32.mxu1 %v961_v4  ;;  %v2531_v56 = vpop.permute.xlu0 %1080  ;;  %v2533_v57 = vpop.permute.xlu1 %1085 }
 0x24a   : > { %1293 = vmatmul.mubr.f32.gmra.mxu0 %v928_v5  ;;  %1373 = vmatmul.mubr.f32.gmra.mxu1 %v960_v6 }
 0x24b   : > { %1297 = vmatprep.mubr.f32.mxu0 %v931_v7  ;;  %1377 = vmatprep.mubr.f32.mxu1 %v963_v8  ;;  %v2535_v58 = vpop.permute.xlu0 %1090  ;;  %v2537_v59 = vpop.permute.xlu1 %1095 }
 0x24e   : > { %1298 = vmatmul.mubr.f32.gmra.mxu0 %v930_v9  ;;  %1378 = vmatmul.mubr.f32.gmra.mxu1 %v962_v10 }
 0x24f   : > { %1302 = vmatprep.mubr.f32.mxu0 %v933_v11  ;;  %1382 = vmatprep.mubr.f32.mxu1 %v965_v12  ;;  %v2539_v60 = vpop.permute.xlu0 %1100  ;;  %v2541_v61 = vpop.permute.xlu1 %1105 }
 0x252   : > { %1303 = vmatmul.mubr.f32.gmra.mxu0 %v932_v13  ;;  %1383 = vmatmul.mubr.f32.gmra.mxu1 %v964_v14 }
 0x253   : > { %1307 = vmatprep.mubr.f32.mxu0 %v935_v15  ;;  %1387 = vmatprep.mubr.f32.mxu1 %v967_v16  ;;  %v2543_v62 = vpop.permute.xlu0 %1110  ;;  %v2545_v63 = vpop.permute.xlu1 %1115 }
 0x256   : > { %1308 = vmatmul.mubr.f32.gmra.mxu0 %v934_v17  ;;  %1388 = vmatmul.mubr.f32.gmra.mxu1 %v966_v18 }
 0x257   : > { %1312 = vmatprep.mubr.f32.mxu0 %v937_v19  ;;  %1392 = vmatprep.mubr.f32.mxu1 %v969_v20  ;;  %v2547_v1 = vpop.permute.xlu0 %1120  ;;  %v2549_v2 = vpop.permute.xlu1 %1125 }
 0x25a   : > { %1313 = vmatmul.mubr.f32.gmra.mxu0 %v936_v21  ;;  %1393 = vmatmul.mubr.f32.gmra.mxu1 %v968_v22 }
 0x25b   : > { %1317 = vmatprep.mubr.f32.mxu0 %v939_v23  ;;  %1397 = vmatprep.mubr.f32.mxu1 %v971_v24  ;;  %v1131_v3 = vpop.permute.xlu0 %1130  ;;  %v1136_v10 = vpop.permute.xlu1 %1135 }
 0x25e   : > { %1318 = vmatmul.mubr.f32.gmra.mxu0 %v938_v25  ;;  %1398 = vmatmul.mubr.f32.gmra.mxu1 %v970_v26 }
 0x25f   : > { %1322 = vmatprep.mubr.f32.mxu0 %v941_v27  ;;  %1402 = vmatprep.mubr.f32.mxu1 %v973_v28  ;;  %v1141_v21 = vpop.permute.xlu0 %1140 }
 0x262   : > { %1323 = vmatmul.mubr.f32.gmra.mxu0 %v940_v29  ;;  %1403 = vmatmul.mubr.f32.gmra.mxu1 %v972_v30 }
 0x263   : > { %1327 = vmatprep.mubr.f32.mxu0 %v943_v31  ;;  %1407 = vmatprep.mubr.f32.mxu1 %v975_v32  ;;  %v1146_v32 = vpop.permute.xlu1 %1145 }
 0x266   : > { %1328 = vmatmul.mubr.f32.gmra.mxu0 %v942_v33  ;;  %1408 = vmatmul.mubr.f32.gmra.mxu1 %v974_v34 }
 0x267   : > { %1332 = vmatprep.mubr.f32.mxu0 %v945_v35  ;;  %1412 = vmatprep.mubr.f32.mxu1 %v977_v36 }
 0x26a   : > { %1333 = vmatmul.mubr.f32.gmra.mxu0 %v944_v37  ;;  %1413 = vmatmul.mubr.f32.gmra.mxu1 %v976_v38 }
 0x26b   : > { %1337 = vmatprep.mubr.f32.mxu0 %v947_v39  ;;  %1417 = vmatprep.mubr.f32.mxu1 %v979_v40 }
 0x26e   : > { %1338 = vmatmul.mubr.f32.gmra.mxu0 %v946_v41  ;;  %1418 = vmatmul.mubr.f32.gmra.mxu1 %v978_v42 }
 0x26f   : > { %1342 = vmatprep.mubr.f32.mxu0 %v949_v43  ;;  %1422 = vmatprep.mubr.f32.mxu1 %v981_v44  ;;  %v1151_v43 = vpop.permute.xlu0 %1150 }
 0x272   : > { %1343 = vmatmul.mubr.f32.gmra.mxu0 %v948_v45  ;;  %1423 = vmatmul.mubr.f32.gmra.mxu1 %v980_v46 }
 0x273   : > { %1347 = vmatprep.mubr.f32.mxu0 %v951_v47  ;;  %1427 = vmatprep.mubr.f32.mxu1 %v983_v48 }
 0x276   : > { %1348 = vmatmul.mubr.f32.gmra.mxu0 %v950_v49  ;;  %1428 = vmatmul.mubr.f32.gmra.mxu1 %v982_v50 }
 0x2fa   : > { %v1274_v4 = vpop.f32.mrf.mxu0  ;;  %v1354_v5 = vpop.f32.mrf.mxu1 }
 0x2fb   : > { %v1275_v6 = vadd.f32 %v1274_v4, %v1051_v51  ;;  %v1355_v7 = vadd.f32 %v1354_v5, %v1131_v3 }
 0x2fc   : > { %v1276_v8 = vpop.f32.mrf.mxu0  ;;  %v1356_v9 = vpop.f32.mrf.mxu1 }
 0x2fd   : > { %vm1433_vm2 = vcmp.ge.f32.partialorder %v1275_v6, 0.0  ;;  %v1465_v11 = vmul.f32 0.2, %v1275_v6  ;;  %vm1449_vm3 = vcmp.ge.f32.partialorder %v1355_v7, 0.0  ;;  %v1481_v12 = vmul.f32 0.2, %v1355_v7 }
 0x2fe   : > { %v1279_v13 = vpop.f32.mrf.mxu0  ;;  %v1359_v14 = vpop.f32.mrf.mxu1 }
 0x2ff   : > { %v1497_v15 = vsel %vm1433_vm2, %v1275_v6, %v1465_v11  ;;  %v1513_v16 = vsel %vm1449_vm3, %v1355_v7, %v1481_v12  ;;  %v1280_v17 = vadd.f32 %v1279_v13, %v1056_v53  ;;  %v1360_v18 = vadd.f32 %v1359_v14, %v1136_v10  ;;  %v1161_v12 = vpop.permute.xlu0 %1160 }
 0x300   : > { %1529 = vst.msk [vmem:[%s2555_s26] sm:$0xff] %vm436_vm0, %v1497_v15  ;;  %1545 = vst.msk [vmem:[%s2555_s26 + $0x80] sm:$0xff] %vm436_vm0, %v1513_v16  ;;  %v1281_v19 = vpop.f32.mrf.mxu0  ;;  %v1361_v20 = vpop.f32.mrf.mxu1 }
 0x301   : > { %vm1434_vm4 = vcmp.ge.f32.partialorder %v1280_v17, 0.0  ;;  %v1466_v22 = vmul.f32 0.2, %v1280_v17  ;;  %vm1450_vm5 = vcmp.ge.f32.partialorder %v1360_v18, 0.0  ;;  %v1482_v23 = vmul.f32 0.2, %v1360_v18 }
 0x302   : > { %v1284_v24 = vpop.f32.mrf.mxu0  ;;  %v1364_v25 = vpop.f32.mrf.mxu1 }
 0x303   : > { %v1498_v26 = vsel %vm1434_vm4, %v1280_v17, %v1466_v22  ;;  %v1514_v27 = vsel %vm1450_vm5, %v1360_v18, %v1482_v23  ;;  %v1285_v28 = vadd.f32 %v1284_v24, %v1061_v52  ;;  %v1365_v29 = vadd.f32 %v1364_v25, %v1141_v21 }
 0x304   : > { %1530 = vst.msk [vmem:[%s2555_s26 + $0x8] sm:$0xff] %vm436_vm0, %v1498_v26  ;;  %1546 = vst.msk [vmem:[%s2555_s26 + $0x88] sm:$0xff] %vm436_vm0, %v1514_v27  ;;  %v1286_v30 = vpop.f32.mrf.mxu0  ;;  %v1366_v31 = vpop.f32.mrf.mxu1 }
 0x305   : > { %vm1435_vm6 = vcmp.ge.f32.partialorder %v1285_v28, 0.0  ;;  %v1467_v33 = vmul.f32 0.2, %v1285_v28  ;;  %vm1451_vm7 = vcmp.ge.f32.partialorder %v1365_v29, 0.0  ;;  %v1483_v34 = vmul.f32 0.2, %v1365_v29 }
 0x306   : > { %v1289_v35 = vpop.f32.mrf.mxu0  ;;  %v1369_v36 = vpop.f32.mrf.mxu1 }
 0x307   : > { %v1499_v37 = vsel %vm1435_vm6, %v1285_v28, %v1467_v33  ;;  %v1515_v38 = vsel %vm1451_vm7, %v1365_v29, %v1483_v34  ;;  %v1290_v39 = vadd.f32 %v1289_v35, %v1066_v54  ;;  %v1370_v40 = vadd.f32 %v1369_v36, %v1146_v32  ;;  %v1156_v54 = vpop.permute.xlu1 %1155  ;;  %v1171_v32 = vpop.permute.xlu0 %1170 }
 0x308   : > { %1531 = vst.msk [vmem:[%s2555_s26 + $0x10] sm:$0xff] %vm436_vm0, %v1499_v37  ;;  %1547 = vst.msk [vmem:[%s2555_s26 + $0x90] sm:$0xff] %vm436_vm0, %v1515_v38  ;;  %v1291_v41 = vpop.f32.mrf.mxu0  ;;  %v1371_v42 = vpop.f32.mrf.mxu1 }
 0x309   : > { %vm1436_vm8 = vcmp.ge.f32.partialorder %v1290_v39, 0.0  ;;  %v1468_v44 = vmul.f32 0.2, %v1290_v39  ;;  %vm1452_vm9 = vcmp.ge.f32.partialorder %v1370_v40, 0.0  ;;  %v1484_v45 = vmul.f32 0.2, %v1370_v40 }
 0x30a   : > { %v1294_v46 = vpop.f32.mrf.mxu0  ;;  %v1374_v47 = vpop.f32.mrf.mxu1 }
 0x30b   : > { %v1500_v48 = vsel %vm1436_vm8, %v1290_v39, %v1468_v44  ;;  %v1516_v49 = vsel %vm1452_vm9, %v1370_v40, %v1484_v45  ;;  %v1295_v50 = vadd.f32 %v1294_v46, %v2527_v0  ;;  %v1375_v51 = vadd.f32 %v1374_v47, %v1151_v43  ;;  %v1166_v22 = vpop.permute.xlu1 %1165 }
 0x30c   : > { %1532 = vst.msk [vmem:[%s2555_s26 + $0x18] sm:$0xff] %vm436_vm0, %v1500_v48  ;;  %1548 = vst.msk [vmem:[%s2555_s26 + $0x98] sm:$0xff] %vm436_vm0, %v1516_v49  ;;  %v1296_v52 = vpop.f32.mrf.mxu0  ;;  %v1376_v53 = vpop.f32.mrf.mxu1 }
 0x30d   : > { %vm1437_vm10 = vcmp.ge.f32.partialorder %v1295_v50, 0.0  ;;  %v1469_v3 = vmul.f32 0.2, %v1295_v50  ;;  %vm1453_vm11 = vcmp.ge.f32.partialorder %v1375_v51, 0.0  ;;  %v1485_v4 = vmul.f32 0.2, %v1375_v51  ;;  %v1181_v52 = vpop.permute.xlu0 %1180 }
 0x30e   : > { %v1299_v5 = vpop.f32.mrf.mxu0  ;;  %v1379_v6 = vpop.f32.mrf.mxu1 }
 0x30f   : > { %v1501_v7 = vsel %vm1437_vm10, %v1295_v50, %v1469_v3  ;;  %v1517_v8 = vsel %vm1453_vm11, %v1375_v51, %v1485_v4  ;;  %v1300_v0 = vadd.f32 %v1299_v5, %v2529_v55  ;;  %v1380_v9 = vadd.f32 %v1379_v6, %v1156_v54  ;;  %v1176_v42 = vpop.permute.xlu1 %1175 }
 0x310   : > { %1533 = vst.msk [vmem:[%s2555_s26 + $0x20] sm:$0xff] %vm436_vm0, %v1501_v7  ;;  %1549 = vst.msk [vmem:[%s2555_s26 + $0xa0] sm:$0xff] %vm436_vm0, %v1517_v8  ;;  %v1301_v10 = vpop.f32.mrf.mxu0  ;;  %v1381_v11 = vpop.f32.mrf.mxu1 }
 0x311   : > { %vm1438_vm12 = vcmp.ge.f32.partialorder %v1300_v0, 0.0  ;;  %v1470_v13 = vmul.f32 0.2, %v1300_v0  ;;  %vm1454_vm13 = vcmp.ge.f32.partialorder %v1380_v9, 0.0  ;;  %v1486_v14 = vmul.f32 0.2, %v1380_v9 }
 0x312   : > { %v1304_v15 = vpop.f32.mrf.mxu0  ;;  %v1384_v16 = vpop.f32.mrf.mxu1 }
 0x313   : > { %v1502_v17 = vsel %vm1438_vm12, %v1300_v0, %v1470_v13  ;;  %v1518_v18 = vsel %vm1454_vm13, %v1380_v9, %v1486_v14  ;;  %v1305_v55 = vadd.f32 %v1304_v15, %v2531_v56  ;;  %v1385_v19 = vadd.f32 %v1384_v16, %v1161_v12  ;;  %v1186_v9 = vpop.permute.xlu1 %1185 }
 0x314   : > { %1534 = vst.msk [vmem:[%s2555_s26 + $0x28] sm:$0xff] %vm436_vm0, %v1502_v17  ;;  %1550 = vst.msk [vmem:[%s2555_s26 + $0xa8] sm:$0xff] %vm436_vm0, %v1518_v18  ;;  %v1306_v20 = vpop.f32.mrf.mxu0  ;;  %v1386_v21 = vpop.f32.mrf.mxu1 }
 0x315   : > { %vm1439_vm14 = vcmp.ge.f32.partialorder %v1305_v55, 0.0  ;;  %v1471_v23 = vmul.f32 0.2, %v1305_v55  ;;  %vm1455_vm15 = vcmp.ge.f32.partialorder %v1385_v19, 0.0  ;;  %v1487_v24 = vmul.f32 0.2, %v1385_v19 }
 0x316   : > { %v1309_v25 = vpop.f32.mrf.mxu0  ;;  %v1389_v26 = vpop.f32.mrf.mxu1 }
 0x317   : > { %v1503_v27 = vsel %vm1439_vm14, %v1305_v55, %v1471_v23  ;;  %v1519_v28 = vsel %vm1455_vm15, %v1385_v19, %v1487_v24  ;;  %v1310_v56 = vadd.f32 %v1309_v25, %v2533_v57  ;;  %v1390_v29 = vadd.f32 %v1389_v26, %v1166_v22  ;;  %v1191_v55 = vpop.permute.xlu0 %1190 }
 0x318   : > { %1535 = vst.msk [vmem:[%s2555_s26 + $0x30] sm:$0xff] %vm436_vm0, %v1503_v27  ;;  %1551 = vst.msk [vmem:[%s2555_s26 + $0xb0] sm:$0xff] %vm436_vm0, %v1519_v28  ;;  %v1311_v30 = vpop.f32.mrf.mxu0  ;;  %v1391_v31 = vpop.f32.mrf.mxu1 }
 0x319   : > { %vm1440_vm1 = vcmp.ge.f32.partialorder %v1310_v56, 0.0  ;;  %v1472_v33 = vmul.f32 0.2, %v1310_v56  ;;  %vm1456_vm2 = vcmp.ge.f32.partialorder %v1390_v29, 0.0  ;;  %v1488_v34 = vmul.f32 0.2, %v1390_v29  ;;  %v1196_v28 = vpop.permute.xlu1 %1195 }
 0x31a   : > { %v1314_v35 = vpop.f32.mrf.mxu0  ;;  %v1394_v36 = vpop.f32.mrf.mxu1 }
 0x31b   : > { %v1504_v37 = vsel %vm1440_vm1, %v1310_v56, %v1472_v33  ;;  %v1520_v38 = vsel %vm1456_vm2, %v1390_v29, %v1488_v34  ;;  %v1315_v57 = vadd.f32 %v1314_v35, %v2535_v58  ;;  %v1395_v39 = vadd.f32 %v1394_v36, %v1171_v32 }
 0x31c   : > { %1536 = vst.msk [vmem:[%s2555_s26 + $0x38] sm:$0xff] %vm436_vm0, %v1504_v37  ;;  %1552 = vst.msk [vmem:[%s2555_s26 + $0xb8] sm:$0xff] %vm436_vm0, %v1520_v38  ;;  %v1316_v40 = vpop.f32.mrf.mxu0  ;;  %v1396_v41 = vpop.f32.mrf.mxu1 }
 0x31d   : > { %vm1441_vm3 = vcmp.ge.f32.partialorder %v1315_v57, 0.0  ;;  %v1473_v43 = vmul.f32 0.2, %v1315_v57  ;;  %vm1457_vm4 = vcmp.ge.f32.partialorder %v1395_v39, 0.0  ;;  %v1489_v44 = vmul.f32 0.2, %v1395_v39  ;;  %v1201_v37 = vpop.permute.xlu0 %1200 }
 0x31e   : > { %v1319_v45 = vpop.f32.mrf.mxu0  ;;  %v1399_v46 = vpop.f32.mrf.mxu1 }
 0x31f   : > { %v1505_v47 = vsel %vm1441_vm3, %v1315_v57, %v1473_v43  ;;  %v1521_v48 = vsel %vm1457_vm4, %v1395_v39, %v1489_v44  ;;  %v1320_v58 = vadd.f32 %v1319_v45, %v2537_v59  ;;  %v1400_v49 = vadd.f32 %v1399_v46, %v1176_v42  ;;  %v1206_v46 = vpop.permute.xlu1 %1205 }
 0x320   : > { %1537 = vst.msk [vmem:[%s2555_s26 + $0x40] sm:$0xff] %vm436_vm0, %v1505_v47  ;;  %1553 = vst.msk [vmem:[%s2555_s26 + $0xc0] sm:$0xff] %vm436_vm0, %v1521_v48  ;;  %v1321_v50 = vpop.f32.mrf.mxu0  ;;  %v1401_v51 = vpop.f32.mrf.mxu1 }
 0x321   : > { %vm1442_vm5 = vcmp.ge.f32.partialorder %v1320_v58, 0.0  ;;  %v1474_v53 = vmul.f32 0.2, %v1320_v58  ;;  %vm1458_vm6 = vcmp.ge.f32.partialorder %v1400_v49, 0.0  ;;  %v1490_v54 = vmul.f32 0.2, %v1400_v49 }
 0x322   : > { %v1324_v3 = vpop.f32.mrf.mxu0  ;;  %v1404_v4 = vpop.f32.mrf.mxu1 }
 0x323   : > { %v1506_v5 = vsel %vm1442_vm5, %v1320_v58, %v1474_v53  ;;  %v1522_v6 = vsel %vm1458_vm6, %v1400_v49, %v1490_v54  ;;  %v1325_v59 = vadd.f32 %v1324_v3, %v2539_v60  ;;  %v1405_v7 = vadd.f32 %v1404_v4, %v1181_v52 }
 0x324   : > { %1538 = vst.msk [vmem:[%s2555_s26 + $0x48] sm:$0xff] %vm436_vm0, %v1506_v5  ;;  %1554 = vst.msk [vmem:[%s2555_s26 + $0xc8] sm:$0xff] %vm436_vm0, %v1522_v6  ;;  %v1326_v8 = vpop.f32.mrf.mxu0  ;;  %v1406_v0 = vpop.f32.mrf.mxu1 }
 0x325   : > { %vm1443_vm7 = vcmp.ge.f32.partialorder %v1325_v59, 0.0  ;;  %v1475_v10 = vmul.f32 0.2, %v1325_v59  ;;  %vm1459_vm8 = vcmp.ge.f32.partialorder %v1405_v7, 0.0  ;;  %v1491_v11 = vmul.f32 0.2, %v1405_v7 }
 0x326   : > { %v1329_v12 = vpop.f32.mrf.mxu0  ;;  %v1409_v13 = vpop.f32.mrf.mxu1 }
 0x327   : > { %v1507_v14 = vsel %vm1443_vm7, %v1325_v59, %v1475_v10  ;;  %v1523_v15 = vsel %vm1459_vm8, %v1405_v7, %v1491_v11  ;;  %v1330_v60 = vadd.f32 %v1329_v12, %v2541_v61  ;;  %v1410_v16 = vadd.f32 %v1409_v13, %v1186_v9 }
 0x328   : > { %1539 = vst.msk [vmem:[%s2555_s26 + $0x50] sm:$0xff] %vm436_vm0, %v1507_v14  ;;  %1555 = vst.msk [vmem:[%s2555_s26 + $0xd0] sm:$0xff] %vm436_vm0, %v1523_v15  ;;  %v1331_v17 = vpop.f32.mrf.mxu0  ;;  %v1411_v18 = vpop.f32.mrf.mxu1 }
 0x329   : > { %vm1444_vm9 = vcmp.ge.f32.partialorder %v1330_v60, 0.0  ;;  %v1476_v19 = vmul.f32 0.2, %v1330_v60  ;;  %vm1460_vm10 = vcmp.ge.f32.partialorder %v1410_v16, 0.0  ;;  %v1492_v20 = vmul.f32 0.2, %v1410_v16 }
 0x32a   : > { %v1334_v21 = vpop.f32.mrf.mxu0  ;;  %v1414_v22 = vpop.f32.mrf.mxu1 }
 0x32b   : > { %v1508_v23 = vsel %vm1444_vm9, %v1330_v60, %v1476_v19  ;;  %v1524_v24 = vsel %vm1460_vm10, %v1410_v16, %v1492_v20  ;;  %v1335_v61 = vadd.f32 %v1334_v21, %v2543_v62  ;;  %v1415_v25 = vadd.f32 %v1414_v22, %v1191_v55 }
 0x32c   : > { %1540 = vst.msk [vmem:[%s2555_s26 + $0x58] sm:$0xff] %vm436_vm0, %v1508_v23  ;;  %1556 = vst.msk [vmem:[%s2555_s26 + $0xd8] sm:$0xff] %vm436_vm0, %v1524_v24  ;;  %v1336_v26 = vpop.f32.mrf.mxu0  ;;  %v1416_v27 = vpop.f32.mrf.mxu1 }
 0x32d   : > { %vm1445_vm11 = vcmp.ge.f32.partialorder %v1335_v61, 0.0  ;;  %v1477_v56 = vmul.f32 0.2, %v1335_v61  ;;  %vm1461_vm12 = vcmp.ge.f32.partialorder %v1415_v25, 0.0  ;;  %v1493_v29 = vmul.f32 0.2, %v1415_v25 }
 0x32e   : > { %v1339_v30 = vpop.f32.mrf.mxu0  ;;  %v1419_v31 = vpop.f32.mrf.mxu1 }
 0x32f   : > { %v1509_v32 = vsel %vm1445_vm11, %v1335_v61, %v1477_v56  ;;  %v1525_v33 = vsel %vm1461_vm12, %v1415_v25, %v1493_v29  ;;  %v1340_v62 = vadd.f32 %v1339_v30, %v2545_v63  ;;  %v1420_v34 = vadd.f32 %v1419_v31, %v1196_v28 }
 0x330   : > { %1541 = vst.msk [vmem:[%s2555_s26 + $0x60] sm:$0xff] %vm436_vm0, %v1509_v32  ;;  %1557 = vst.msk [vmem:[%s2555_s26 + $0xe0] sm:$0xff] %vm436_vm0, %v1525_v33  ;;  %v1341_v35 = vpop.f32.mrf.mxu0  ;;  %v1421_v36 = vpop.f32.mrf.mxu1 }
 0x331   : > { %vm1446_vm13 = vcmp.ge.f32.partialorder %v1340_v62, 0.0  ;;  %v1478_v38 = vmul.f32 0.2, %v1340_v62  ;;  %vm1462_vm14 = vcmp.ge.f32.partialorder %v1420_v34, 0.0  ;;  %v1494_v57 = vmul.f32 0.2, %v1420_v34 }
 0x332   : > { %v1344_v39 = vpop.f32.mrf.mxu0  ;;  %v1424_v40 = vpop.f32.mrf.mxu1 }
 0x333   : > { %v1510_v41 = vsel %vm1446_vm13, %v1340_v62, %v1478_v38  ;;  %v1526_v42 = vsel %vm1462_vm14, %v1420_v34, %v1494_v57  ;;  %v1345_v63 = vadd.f32 %v1344_v39, %v2547_v1  ;;  %v1425_v43 = vadd.f32 %v1424_v40, %v1201_v37 }
 0x334   : > { %1542 = vst.msk [vmem:[%s2555_s26 + $0x68] sm:$0xff] %vm436_vm0, %v1510_v41  ;;  %1558 = vst.msk [vmem:[%s2555_s26 + $0xe8] sm:$0xff] %vm436_vm0, %v1526_v42  ;;  %v1346_v44 = vpop.f32.mrf.mxu0  ;;  %v1426_v45 = vpop.f32.mrf.mxu1 }
 0x335   : > { %vm1447_vm15 = vcmp.ge.f32.partialorder %v1345_v63, 0.0  ;;  %v1479_v47 = vmul.f32 0.2, %v1345_v63  ;;  %vm1463_vm1 = vcmp.ge.f32.partialorder %v1425_v43, 0.0  ;;  %v1495_v48 = vmul.f32 0.2, %v1425_v43 }
 0x336   : > { %v1349_v58 = vpop.f32.mrf.mxu0  ;;  %v1429_v49 = vpop.f32.mrf.mxu1 }
 0x337   : > { %v1511_v50 = vsel %vm1447_vm15, %v1345_v63, %v1479_v47  ;;  %v1527_v1 = vsel %vm1463_vm1, %v1425_v43, %v1495_v48  ;;  %v1350_v51 = vadd.f32 %v1349_v58, %v2549_v2  ;;  %v1430_v52 = vadd.f32 %v1429_v49, %v1206_v46 }
 0x338   : > { %1543 = vst.msk [vmem:[%s2555_s26 + $0x70] sm:$0xff] %vm436_vm0, %v1511_v50  ;;  %1559 = vst.msk [vmem:[%s2555_s26 + $0xf0] sm:$0xff] %vm436_vm0, %v1527_v1  ;;  %v1351_v53 = vpop.f32.mrf.mxu0  ;;  %v1431_v54 = vpop.f32.mrf.mxu1 }
 0x339   : > { %vm1448_vm2 = vcmp.ge.f32.partialorder %v1350_v51, 0.0  ;;  %v1480_v3 = vmul.f32 0.2, %v1350_v51  ;;  %vm1464_vm3 = vcmp.ge.f32.partialorder %v1430_v52, 0.0  ;;  %v1496_v4 = vmul.f32 0.2, %v1430_v52 }
 0x33b   : > { %v1512_v5 = vsel %vm1448_vm2, %v1350_v51, %v1480_v3  ;;  %v1528_v6 = vsel %vm1464_vm3, %v1430_v52, %v1496_v4 }
 0x33c   : > { %1544 = vst.msk [vmem:[%s2555_s26 + $0x78] sm:$0xff] %vm436_vm0, %v1512_v5  ;;  %1560 = vst.msk [vmem:[%s2555_s26 + $0xf8] sm:$0xff] %vm436_vm0, %v1528_v6 }
 0x33d PF: > { %s17_s18 = sadd.s32 1, %s2012_s18  }
 0x33e   : > { %p14_p2 = scmp.ge.s32.totalorder %s17_s18, 4  }
 0x340   :  { %16 = sbr.rel (!%p14_p2) target bundleno = 2 (0x2), region = 82 }
 0x345   :  { %1582 = vsyncpa [#allocation4], 1 }
 0x346   :  { %1584 = vsyncpa [#allocation4 + $0x1], 1 }
 0x347   :  { %1585 = vsyncpa [#allocation6], 1 }

</bundles_post_ra>
